<compile_context>
chip_gen: v5e
topology: v5e:2x2
jax: 0.10.0
libtpu: 0.0.40
codegen_flags: <defaults>
</compile_context>

<pallas_src>
import jax
import jax.numpy as jnp
from jax.experimental import pallas as pl
from jax.experimental.pallas import tpu as pltpu

BN_EPS = 1e-5
# MXU operand dtype.  Use jnp.bfloat16 on v6e/v7x at production sizes
# (re-baseline the allclose tolerance); f32 accumulation is always kept.
MXU_DTYPE = jnp.float32


# ---------------------------------------------------------------------------
# Fused kernel: conv3x3(SAME) + bias + ReLU + global-avg-pool -> (B, F) rep in
# resident VMEM scratch, then (last grid step) the projector MLP with
# training-mode BatchNorm.  Grid: one step per batch *tile* (sequential).
# ---------------------------------------------------------------------------
def _byol_fused_kernel(xpw_ref, wtaps_ref, bconv_ref, w1_ref, b1_ref,
                       g_ref, beta_ref, w2_ref, b2_ref, o_ref, rep_ref):
    i = pl.program_id(0)
    nsteps = pl.num_programs(0)
    TB, Hp, W, C3 = xpw_ref.shape            # batch tile, padded H, W, 3*C
    H = Hp - 2
    F_CH = wtaps_ref.shape[1]

    # --- Backbone: 3x3 SAME conv as ONE fused K=9C matmul.  The kx/channel
    # packing was done once in the wrapper, so the three ky "slabs" below are
    # aligned non-minor-dim slices; they are concatenated on the contraction
    # (lane) axis and fed to a single MXU dot with f32 accumulation.
    slabs = [xpw_ref[:, ky:ky + H, :, :].reshape(TB * H * W, C3)
             for ky in range(3)]
    patches = jnp.concatenate(slabs, axis=-1)                   # (TB*H*W, 9C)
    conv = jnp.dot(patches.astype(MXU_DTYPE),
                   wtaps_ref[...].astype(MXU_DTYPE),
                   preferred_element_type=jnp.float32)          # (TB*H*W, F)
    feats = jnp.maximum(conv + bconv_ref[...], 0.0)             # bias + ReLU
    rep_blk = jnp.mean(feats.reshape(TB, H * W, F_CH), axis=1)  # pool -> (TB,F)

    # Direct contiguous block store of this tile's representation rows
    # (no O(B^2) read-modify-write scatter, no uninitialized-scratch read).
    row0 = pl.multiple_of(i * TB, TB)
    rep_ref[pl.ds(row0, TB), :] = rep_blk

    # --- Projector: Linear -> BatchNorm1d(train) -> ReLU -> Linear.
    #     Runs once, after the whole batch's representation is in VMEM.
    @pl.when(i == nsteps - 1)
    def _():
        rep = rep_ref[...]                                       # (B, F)
        h = jnp.dot(rep.astype(MXU_DTYPE), w1_ref[...].astype(MXU_DTYPE),
                    preferred_element_type=jnp.float32) + b1_ref[...]
        mean = jnp.mean(h, axis=0, keepdims=True)                # batch mean
        var = jnp.mean((h - mean) ** 2, axis=0, keepdims=True)   # biased var
        hn = (h - mean) * jax.lax.rsqrt(var + BN_EPS)
        hn = hn * g_ref[...] + beta_ref[...]
        hr = jnp.maximum(hn, 0.0)
        o_ref[...] = (jnp.dot(hr.astype(MXU_DTYPE), w2_ref[...].astype(MXU_DTYPE),
                              preferred_element_type=jnp.float32)
                      + b2_ref[...]).astype(o_ref.dtype)


def net_wrapper_forward(x, params):
    """NetWrapper.forward: hooked hidden (layer=-2) -> flatten -> projector."""
    B, C, H, W = x.shape
    F_CH = params["w_conv"].shape[0]
    Hd = params["w1"].shape[1]
    P = params["w2"].shape[1]
    Hp = H + 2

    # NCHW -> padded NHWC, then pack the three kx-shifted views onto the
    # channel (lane) axis: (B, Hp, W, 3C).  ~3x the raw image (vs 9x for a
    # full im2col) and it turns every in-kernel tap slice into an aligned
    # non-minor-dim slice (no unaligned sublane relayouts).
    xpad = jnp.pad(jnp.transpose(x, (0, 2, 3, 1)),
                   ((0, 0), (1, 1), (1, 1), (0, 0)))             # (B,Hp,Wp,C)
    xpw = jnp.concatenate([xpad[:, :, kx:kx + W, :] for kx in range(3)],
                          axis=-1)                               # (B,Hp,W,3C)
    # (F, C, 3, 3) -> (ky, kx, C, F) -> (9C, F); row ky*3C + kx*C + c matches
    # the in-kernel patch column ordering.
    w_taps = jnp.transpose(params["w_conv"], (2, 3, 1, 0)).reshape(9 * C, F_CH)

    # Batch tile: amortizes per-grid-step pipeline overhead and makes the rep
    # write one contiguous block store per step.
    TB = next(t for t in (32, 16, 8, 4, 2, 1) if B % t == 0)
    nsteps = B // TB

    full = lambda *s: pl.BlockSpec(s, lambda i: (0,) * len(s))

    flops = (2 * B * H * W * 9 * C * F_CH            # conv as one matmul
             + 2 * B * F_CH * Hd + 2 * B * Hd * P)   # projector matmuls
    bytes_accessed = 4 * (xpw.size + w_taps.size + F_CH + F_CH * Hd + 3 * Hd
                          + Hd * P + P + B * P)

    # VMEM budget from actual block/scratch sizes (x2 for double buffering,
    # generous headroom for in-kernel temporaries), capped well below v7x's
    # 64 MiB physical per-core VMEM.
    blk_bytes = 4 * (TB * Hp * W * 3 * C + 9 * C * F_CH + F_CH
                     + F_CH * Hd + 3 * Hd + Hd * P + P + B * P)
    vmem_limit = int(min(48 * 2 ** 20,
                         max(4 * 2 ** 20, 8 * (2 * blk_bytes + 4 * B * F_CH))))

    return pl.pallas_call(
        _byol_fused_kernel,
        out_shape=jax.ShapeDtypeStruct((B, P), jnp.float32),
        grid=(nsteps,),
        in_specs=[
            pl.BlockSpec((TB, Hp, W, 3 * C), lambda i: (i, 0, 0, 0)),  # images
            full(9 * C, F_CH),       # fused conv taps
            full(1, F_CH),           # conv bias
            full(F_CH, Hd),          # projector w1
            full(1, Hd),             # projector b1
            full(1, Hd),             # bn gamma
            full(1, Hd),             # bn beta
            full(Hd, P),             # projector w2
            full(1, P),              # projector b2
        ],
        out_specs=full(B, P),
        scratch_shapes=[pltpu.VMEM((B, F_CH), jnp.float32)],  # representation
        compiler_params=pltpu.CompilerParams(
            # Resident rep scratch + last-step finalize require a sequential
            # grid (BatchNorm needs full-batch statistics).
            dimension_semantics=("arbitrary",),
            vmem_limit_bytes=vmem_limit,
        ),
        cost_estimate=pl.CostEstimate(
            flops=flops, transcendentals=Hd, bytes_accessed=bytes_accessed),
    )(xpw, w_taps,
      params["b_conv"].reshape(1, F_CH),
      params["w1"], params["b1"].reshape(1, Hd),
      params["gamma"].reshape(1, Hd), params["beta"].reshape(1, Hd),
      params["w2"], params["b2"].reshape(1, P))


# ---------------------------------------------------------------------------
# Pure-JAX reference (for correctness verification of the fused kernel).
# ---------------------------------------------------------------------------
def reference_forward(x, params):
    feats = jax.lax.conv_general_dilated(
        x, params["w_conv"], window_strides=(1, 1), padding="SAME",
        dimension_numbers=("NCHW", "OIHW", "NCHW"))
    feats = jnp.maximum(feats + params["b_conv"][None, :, None, None], 0.0)
    rep = jnp.mean(feats, axis=(2, 3))
    h = rep @ params["w1"] + params["b1"]
    mean = jnp.mean(h, axis=0, keepdims=True)
    var = jnp.mean((h - mean) ** 2, axis=0, keepdims=True)
    hn = (h - mean) * jax.lax.rsqrt(var + BN_EPS)
    hn = hn * params["gamma"] + params["beta"]
    hr = jnp.maximum(hn, 0.0)
    return hr @ params["w2"] + params["b2"]


if __name__ == "__main__":
    key = jax.random.PRNGKey(0)
    B, C, H, W = 2, 4, 16, 16
    F_CH = 8          # backbone feature channels == representation dim
    PROJ_HIDDEN = 32  # projection_hidden_size
    PROJ_SIZE = 16    # projection_size

    ks = jax.random.split(key, 8)
    x = jax.random.normal(ks[0], (B, C, H, W), jnp.float32)
    params = {
        "w_conv": 0.1 * jax.random.normal(ks[1], (F_CH, C, 3, 3), jnp.float32),
        "b_conv": 0.1 * jax.random.normal(ks[2], (F_CH,), jnp.float32),
        "w1": 0.1 * jax.random.normal(ks[3], (F_CH, PROJ_HIDDEN), jnp.float32),
        "b1": 0.1 * jax.random.normal(ks[4], (PROJ_HIDDEN,), jnp.float32),
        "gamma": jnp.ones((PROJ_HIDDEN,), jnp.float32),
        "beta": jnp.zeros((PROJ_HIDDEN,), jnp.float32),
        "w2": 0.1 * jax.random.normal(ks[5], (PROJ_HIDDEN, PROJ_SIZE), jnp.float32),
        "b2": 0.1 * jax.random.normal(ks[6], (PROJ_SIZE,), jnp.float32),
    }

    out = jax.jit(net_wrapper_forward)(x, params)
    out = jax.block_until_ready(out)
    assert out.shape == (B, PROJ_SIZE) and out.dtype == jnp.float32
    assert bool(jnp.all(jnp.isfinite(out)))

    ref = reference_forward(x, params)
    assert bool(jnp.allclose(out, ref, rtol=1e-3, atol=1e-3)), (
        "max abs err = %g" % float(jnp.max(jnp.abs(out - ref))))
    print("KERNEL_OK")
</pallas_src>

<mosaic_0001>
module attributes {stable_mosaic.version = 11 : i64} {
  func.func @_byol_fused_kernel(%arg0: i32, %arg1: memref<2x18x16x12xf32, #tpu.memory_space<vmem>>, %arg2: memref<36x8xf32, #tpu.memory_space<vmem>>, %arg3: memref<1x8xf32, #tpu.memory_space<vmem>>, %arg4: memref<8x32xf32, #tpu.memory_space<vmem>>, %arg5: memref<1x32xf32, #tpu.memory_space<vmem>>, %arg6: memref<1x32xf32, #tpu.memory_space<vmem>>, %arg7: memref<1x32xf32, #tpu.memory_space<vmem>>, %arg8: memref<32x16xf32, #tpu.memory_space<vmem>>, %arg9: memref<1x16xf32, #tpu.memory_space<vmem>>, %arg10: memref<2x16xf32, #tpu.memory_space<vmem>>, %arg11: memref<2x8xf32, #tpu.memory_space<vmem>>) attributes {dimension_semantics = [#tpu.dimension_semantics<arbitrary>], iteration_bounds = array<i64: 1>, scalar_prefetch = 0 : i64, scratch_operands = 1 : i64, tpu.core_type = #tpu.core_type<tc>, window_params = [{transform_indices = @transform_0, window_bounds = array<i64: 2, 18, 16, 12>}, {pipeline_mode = #tpu.pipeline_mode<synchronous>, transform_indices = @transform_1, window_bounds = array<i64: 36, 8>}, {pipeline_mode = #tpu.pipeline_mode<synchronous>, transform_indices = @transform_2, window_bounds = array<i64: 1, 8>}, {pipeline_mode = #tpu.pipeline_mode<synchronous>, transform_indices = @transform_3, window_bounds = array<i64: 8, 32>}, {pipeline_mode = #tpu.pipeline_mode<synchronous>, transform_indices = @transform_4, window_bounds = array<i64: 1, 32>}, {pipeline_mode = #tpu.pipeline_mode<synchronous>, transform_indices = @transform_5, window_bounds = array<i64: 1, 32>}, {pipeline_mode = #tpu.pipeline_mode<synchronous>, transform_indices = @transform_6, window_bounds = array<i64: 1, 32>}, {pipeline_mode = #tpu.pipeline_mode<synchronous>, transform_indices = @transform_7, window_bounds = array<i64: 32, 16>}, {pipeline_mode = #tpu.pipeline_mode<synchronous>, transform_indices = @transform_8, window_bounds = array<i64: 1, 16>}, {pipeline_mode = #tpu.pipeline_mode<synchronous>, transform_indices = @transform_9, window_bounds = array<i64: 2, 16>}]} {
    %c0 = arith.constant 0 : index
    %c0_0 = arith.constant 0 : index
    %c0_1 = arith.constant 0 : index
    %c0_2 = arith.constant 0 : index
    %0 = vector.load %arg1[%c0, %c0_0, %c0_1, %c0_2] : memref<2x18x16x12xf32, #tpu.memory_space<vmem>>, vector<2x16x16x12xf32>
    %1 = vector.shape_cast %0 : vector<2x16x16x12xf32> to vector<512x12xf32>
    %c0_3 = arith.constant 0 : index
    %c1 = arith.constant 1 : index
    %c0_4 = arith.constant 0 : index
    %c0_5 = arith.constant 0 : index
    %2 = vector.load %arg1[%c0_3, %c1, %c0_4, %c0_5] : memref<2x18x16x12xf32, #tpu.memory_space<vmem>>, vector<2x16x16x12xf32>
    %3 = vector.shape_cast %2 : vector<2x16x16x12xf32> to vector<512x12xf32>
    %c0_6 = arith.constant 0 : index
    %c2 = arith.constant 2 : index
    %c0_7 = arith.constant 0 : index
    %c0_8 = arith.constant 0 : index
    %4 = vector.load %arg1[%c0_6, %c2, %c0_7, %c0_8] : memref<2x18x16x12xf32, #tpu.memory_space<vmem>>, vector<2x16x16x12xf32>
    %5 = vector.shape_cast %4 : vector<2x16x16x12xf32> to vector<512x12xf32>
    %6 = tpu.concatenate %1, %3, %5 in 1 : vector<512x12xf32>, vector<512x12xf32>, vector<512x12xf32> -> vector<512x36xf32>
    %c0_9 = arith.constant 0 : index
    %c0_10 = arith.constant 0 : index
    %7 = vector.load %arg2[%c0_9, %c0_10] : memref<36x8xf32, #tpu.memory_space<vmem>>, vector<36x8xf32>
    %cst = arith.constant dense<0.000000e+00> : vector<512x8xf32>
    %8 = tpu.matmul %6, %7, %cst {dimension_numbers = #tpu.dot_dimension_numbers<[1], [0], [0], [1], [0, 0, 1, 1], [], []>} : vector<512x36xf32>, vector<36x8xf32>, vector<512x8xf32> -> vector<512x8xf32>
    %c0_11 = arith.constant 0 : index
    %c0_12 = arith.constant 0 : index
    %9 = vector.load %arg3[%c0_11, %c0_12] : memref<1x8xf32, #tpu.memory_space<vmem>>, vector<1x8xf32>
    %10 = vector.broadcast %9 : vector<1x8xf32> to vector<512x8xf32>
    %11 = arith.addf %8, %10 : vector<512x8xf32>
    %cst_13 = arith.constant 0.000000e+00 : f32
    %12 = vector.broadcast %cst_13 : f32 to vector<512x8xf32>
    %13 = arith.maximumf %11, %12 : vector<512x8xf32>
    %14 = vector.shape_cast %13 : vector<512x8xf32> to vector<2x256x8xf32>
    %cst_14 = arith.constant dense<0.000000e+00> : vector<2x8xf32>
    %15 = vector.multi_reduction <add>, %14, %cst_14 [1] : vector<2x256x8xf32> to vector<2x8xf32>
    %cst_15 = arith.constant 2.560000e+02 : f32
    %16 = vector.broadcast %cst_15 : f32 to vector<2x8xf32>
    %17 = arith.divf %15, %16 : vector<2x8xf32>
    %c2_i32 = arith.constant 2 : i32
    %18 = arith.muli %arg0, %c2_i32 : i32
    %19 = tpu.assume_multiple %18, 2 : i32
    %20 = arith.index_cast %19 : i32 to index
    %c0_16 = arith.constant 0 : index
    %21 = vector.load %arg11[%20, %c0_16] : memref<2x8xf32, #tpu.memory_space<vmem>>, vector<2x8xf32>
    tpu.vector_store %arg11[%20, %c0_16], %17 {strides = array<i32>} : memref<2x8xf32, #tpu.memory_space<vmem>>, vector<2x8xf32>,
    %c0_i32 = arith.constant 0 : i32
    %22 = arith.cmpi eq, %arg0, %c0_i32 : i32
    %23 = arith.extui %22 : i1 to i32
    %c0_i32_17 = arith.constant 0 : i32
    %24 = arith.cmpi ne, %23, %c0_i32_17 : i32
    scf.if %24 {
      %c0_18 = arith.constant 0 : index
      %c0_19 = arith.constant 0 : index
      %25 = vector.load %arg11[%c0_18, %c0_19] : memref<2x8xf32, #tpu.memory_space<vmem>>, vector<2x8xf32>
      %c0_20 = arith.constant 0 : index
      %c0_21 = arith.constant 0 : index
      %26 = vector.load %arg4[%c0_20, %c0_21] : memref<8x32xf32, #tpu.memory_space<vmem>>, vector<8x32xf32>
      %cst_22 = arith.constant dense<0.000000e+00> : vector<2x32xf32>
      %27 = tpu.matmul %25, %26, %cst_22 {dimension_numbers = #tpu.dot_dimension_numbers<[1], [0], [0], [1], [0, 0, 1, 1], [], []>} : vector<2x8xf32>, vector<8x32xf32>, vector<2x32xf32> -> vector<2x32xf32>
      %c0_23 = arith.constant 0 : index
      %c0_24 = arith.constant 0 : index
      %28 = vector.load %arg5[%c0_23, %c0_24] : memref<1x32xf32, #tpu.memory_space<vmem>>, vector<1x32xf32>
      %29 = vector.broadcast %28 : vector<1x32xf32> to vector<2x32xf32>
      %30 = arith.addf %27, %29 : vector<2x32xf32>
      %cst_25 = arith.constant dense<0.000000e+00> : vector<32xf32>
      %31 = vector.multi_reduction <add>, %30, %cst_25 [0] : vector<2x32xf32> to vector<32xf32>
      %32 = vector.shape_cast %31 : vector<32xf32> to vector<1x32xf32>
      %cst_26 = arith.constant 2.000000e+00 : f32
      %33 = vector.broadcast %cst_26 : f32 to vector<1x32xf32>
      %34 = arith.divf %32, %33 : vector<1x32xf32>
      %35 = vector.broadcast %34 : vector<1x32xf32> to vector<2x32xf32>
      %36 = arith.subf %30, %35 : vector<2x32xf32>
      %37 = arith.mulf %36, %36 : vector<2x32xf32>
      %cst_27 = arith.constant dense<0.000000e+00> : vector<32xf32>
      %38 = vector.multi_reduction <add>, %37, %cst_27 [0] : vector<2x32xf32> to vector<32xf32>
      %39 = vector.shape_cast %38 : vector<32xf32> to vector<1x32xf32>
      %cst_28 = arith.constant 2.000000e+00 : f32
      %40 = vector.broadcast %cst_28 : f32 to vector<1x32xf32>
      %41 = arith.divf %39, %40 : vector<1x32xf32>
      %42 = vector.broadcast %34 : vector<1x32xf32> to vector<2x32xf32>
      %43 = arith.subf %30, %42 : vector<2x32xf32>
      %cst_29 = arith.constant 9.99999974E-6 : f32
      %44 = vector.broadcast %cst_29 : f32 to vector<1x32xf32>
      %45 = arith.addf %41, %44 : vector<1x32xf32>
      %46 = math.rsqrt %45 : vector<1x32xf32>
      %47 = vector.broadcast %46 : vector<1x32xf32> to vector<2x32xf32>
      %48 = arith.mulf %43, %47 : vector<2x32xf32>
      %c0_30 = arith.constant 0 : index
      %c0_31 = arith.constant 0 : index
      %49 = vector.load %arg6[%c0_30, %c0_31] : memref<1x32xf32, #tpu.memory_space<vmem>>, vector<1x32xf32>
      %50 = vector.broadcast %49 : vector<1x32xf32> to vector<2x32xf32>
      %51 = arith.mulf %48, %50 : vector<2x32xf32>
      %c0_32 = arith.constant 0 : index
      %c0_33 = arith.constant 0 : index
      %52 = vector.load %arg7[%c0_32, %c0_33] : memref<1x32xf32, #tpu.memory_space<vmem>>, vector<1x32xf32>
      %53 = vector.broadcast %52 : vector<1x32xf32> to vector<2x32xf32>
      %54 = arith.addf %51, %53 : vector<2x32xf32>
      %cst_34 = arith.constant 0.000000e+00 : f32
      %55 = vector.broadcast %cst_34 : f32 to vector<2x32xf32>
      %56 = arith.maximumf %54, %55 : vector<2x32xf32>
      %c0_35 = arith.constant 0 : index
      %c0_36 = arith.constant 0 : index
      %57 = vector.load %arg8[%c0_35, %c0_36] : memref<32x16xf32, #tpu.memory_space<vmem>>, vector<32x16xf32>
      %cst_37 = arith.constant dense<0.000000e+00> : vector<2x16xf32>
      %58 = tpu.matmul %56, %57, %cst_37 {dimension_numbers = #tpu.dot_dimension_numbers<[1], [0], [0], [1], [0, 0, 1, 1], [], []>} : vector<2x32xf32>, vector<32x16xf32>, vector<2x16xf32> -> vector<2x16xf32>
      %c0_38 = arith.constant 0 : index
      %c0_39 = arith.constant 0 : index
      %59 = vector.load %arg9[%c0_38, %c0_39] : memref<1x16xf32, #tpu.memory_space<vmem>>, vector<1x16xf32>
      %60 = vector.broadcast %59 : vector<1x16xf32> to vector<2x16xf32>
      %61 = arith.addf %58, %60 : vector<2x16xf32>
      %c0_40 = arith.constant 0 : index
      %c0_41 = arith.constant 0 : index
      %62 = vector.load %arg10[%c0_40, %c0_41] : memref<2x16xf32, #tpu.memory_space<vmem>>, vector<2x16xf32>
      tpu.vector_store %arg10[%c0_40, %c0_41], %61 {strides = array<i32>} : memref<2x16xf32, #tpu.memory_space<vmem>>, vector<2x16xf32>,
    } else {
    }
    return
  }
  func.func @transform_0(%arg0: i32) -> (i32, i32, i32, i32) {
    %c0_i32 = arith.constant 0 : i32
    %c0_i32_0 = arith.constant 0 : i32
    %c0_i32_1 = arith.constant 0 : i32
    %c0_i32_2 = arith.constant 0 : i32
    return %arg0, %c0_i32, %c0_i32_0, %c0_i32_1 : i32, i32, i32, i32
  }
  func.func @transform_1(%arg0: i32) -> (i32, i32) {
    %c0_i32 = arith.constant 0 : i32
    %c0_i32_0 = arith.constant 0 : i32
    %c0_i32_1 = arith.constant 0 : i32
    return %c0_i32, %c0_i32_0 : i32, i32
  }
  func.func @transform_2(%arg0: i32) -> (i32, i32) {
    %c0_i32 = arith.constant 0 : i32
    %c0_i32_0 = arith.constant 0 : i32
    %c0_i32_1 = arith.constant 0 : i32
    return %c0_i32, %c0_i32_0 : i32, i32
  }
  func.func @transform_3(%arg0: i32) -> (i32, i32) {
    %c0_i32 = arith.constant 0 : i32
    %c0_i32_0 = arith.constant 0 : i32
    %c0_i32_1 = arith.constant 0 : i32
    return %c0_i32, %c0_i32_0 : i32, i32
  }
  func.func @transform_4(%arg0: i32) -> (i32, i32) {
    %c0_i32 = arith.constant 0 : i32
    %c0_i32_0 = arith.constant 0 : i32
    %c0_i32_1 = arith.constant 0 : i32
    return %c0_i32, %c0_i32_0 : i32, i32
  }
  func.func @transform_5(%arg0: i32) -> (i32, i32) {
    %c0_i32 = arith.constant 0 : i32
    %c0_i32_0 = arith.constant 0 : i32
    %c0_i32_1 = arith.constant 0 : i32
    return %c0_i32, %c0_i32_0 : i32, i32
  }
  func.func @transform_6(%arg0: i32) -> (i32, i32) {
    %c0_i32 = arith.constant 0 : i32
    %c0_i32_0 = arith.constant 0 : i32
    %c0_i32_1 = arith.constant 0 : i32
    return %c0_i32, %c0_i32_0 : i32, i32
  }
  func.func @transform_7(%arg0: i32) -> (i32, i32) {
    %c0_i32 = arith.constant 0 : i32
    %c0_i32_0 = arith.constant 0 : i32
    %c0_i32_1 = arith.constant 0 : i32
    return %c0_i32, %c0_i32_0 : i32, i32
  }
  func.func @transform_8(%arg0: i32) -> (i32, i32) {
    %c0_i32 = arith.constant 0 : i32
    %c0_i32_0 = arith.constant 0 : i32
    %c0_i32_1 = arith.constant 0 : i32
    return %c0_i32, %c0_i32_0 : i32, i32
  }
  func.func @transform_9(%arg0: i32) -> (i32, i32) {
    %c0_i32 = arith.constant 0 : i32
    %c0_i32_0 = arith.constant 0 : i32
    %c0_i32_1 = arith.constant 0 : i32
    return %c0_i32, %c0_i32_0 : i32, i32
  }
}

</mosaic_0001>

<bundles_post_ra>
// kernel: net_wrapper_forward.1
= control target key start
LH: loop header
LB: loop body
LE: loop exit
PB: predicated region body
PF: predicated region fallthrough
CT: control target
= control target key end

     0   :  { %s1890_s13 = smov 12   ;;  %s3069_s0 = inlined_call_operand.vmem [shape: f32[2,18,16,12], index: 0, kind: input, shape index: {}]   ;;  %s3070_s1 = inlined_call_operand.vmem [shape: f32[36,8], index: 1, kind: input, shape index: {}]   ;;  %s3071_s2 = inlined_call_operand.vmem [shape: f32[1,8], index: 2, kind: input, shape index: {}]   ;;  %s3072_s3 = inlined_call_operand.vmem [shape: f32[8,32], index: 3, kind: input, shape index: {}]   ;;  %s3073_s4 = inlined_call_operand.vmem [shape: f32[1,32], index: 4, kind: input, shape index: {}]   ;;  %s3074_s5 = inlined_call_operand.vmem [shape: f32[1,32], index: 5, kind: input, shape index: {}]   ;;  %s3075_s6 = inlined_call_operand.vmem [shape: f32[1,32], index: 6, kind: input, shape index: {}]   ;;  %s3076_s7 = inlined_call_operand.vmem [shape: f32[32,16], index: 7, kind: input, shape index: {}]   ;;  %s3077_s8 = inlined_call_operand.vmem [shape: f32[1,16], index: 8, kind: input, shape index: {}]   ;;  %s3078_s9 = inlined_call_operand.hbm [shape: f32[2,16], index: 9, kind: output, shape index: {}]  }
   0x1   :  { %v1948_v0 = vld [vmem:[%s3069_s0 + $0xa0] sm:$0xff]  ;;  %v1953_v1 = vld [vmem:[%s3069_s0 + $0x98] sm:$0xff]  ;;  %v1962_v2 = vld [vmem:[%s3069_s0 + $0xa8] sm:$0xff] }
   0x2   :  { %327 = vrot.lane.b32.xlu1 %v1948_v0, %s1890_s13  ;;  %325 = vrot.lane.b32.xlu0 %v1953_v1, %s1890_s13 }
   0x3   :  { %329 = vrot.lane.b32.xlu2 %v1962_v2, %s1890_s13 }
   0x4   :  { %14 = vsyncpa [#allocation4], 0  ;;  %v1969_v3 = vld [vmem:[%s3069_s0 + $0xb0] sm:$0xff]  ;;  %v1974_v4 = vld [vmem:[%s3069_s0 + $0xb8] sm:$0xff]  ;;  %s1891_s20 = smov 24   ;;  %vm1071_vm0 = vcmask 1043456  }
   0x5   :  { %v1985_v5 = vld [vmem:[%s3069_s0 + $0x20] sm:$0xff]  ;;  %v1990_v6 = vld [vmem:[%s3069_s0 + $0x10] sm:$0xff]  ;;  %v2001_v7 = vld [vmem:[%s3069_s0 + $0x18] sm:$0xff]  ;;  %vm739_vm1 = vcmask 97280   ;;  %vm804_vm2 = vcmask 195584   ;;  %vm878_vm3 = vcmask 293888  }
   0x6   :  { %v2006_v8 = vld [vmem:[%s3069_s0 + $0xc0] sm:$0xff]  ;;  %v2011_v9 = vld [vmem:[%s3069_s0 + $0x28] sm:$0xff]  ;;  %v2027_v11 = vld [vmem:[%s3069_s0 + $0x138] sm:$0xff]  ;;  %vm1348_vm4 = vcmask 64512   ;;  %vm1499_vm6 = vcmask 1041409   ;;  %vm1503_vm7 = vcmask 58368  }
   0x7   :  { %v2022_v10 = vld [vmem:[%s3069_s0 + $0xc8] sm:$0xff]  ;;  %v2043_v13 = vld [vmem:[%s3069_s0 + $0x30] sm:$0xff]  ;;  %v2059_v15 = vld [vmem:[%s3069_s0 + $0x140] sm:$0xff]  ;;  %vm1538_vm8 = vcmask 254976   ;;  %vm1595_vm13 = vcmask 261120   ;;  %s1894_s28 = smov [#allocation3]  }
   0x8   :  { %v2038_v12 = vld [vmem:[%s3069_s0 + $0x148] sm:$0xff]  ;;  %v2054_v14 = vld [vmem:[%s3069_s0 + $0xd0] sm:$0xff]  ;;  %v2086_v18 = vld [vmem:[%s3069_s0 + $0x1b8] sm:$0xff]  ;;  %s1626_s29 = sshll.u32 %s1894_s28, 4  ;;  %vm1619_vm14 = vcmask 123904   ;;  %s1627_s29 = int_to_ptr.vmem [resolvable:$true] %s1626_s29 }
   0x9   :  { %v2070_v16 = vld [vmem:[%s3069_s0 + $0x150] sm:$0xff]  ;;  %v2075_v17 = vld [vmem:[%s3069_s0 + $0x1a8] sm:$0xff]  ;;  %v2091_v19 = vld [vmem:[%s3069_s0 + $0x38] sm:$0xff] }
   0xa   :  { %583 = vrot.lane.b32.xlu1 %v1969_v3, %s1891_s20  ;;  %581 = vrot.lane.b32.xlu0 %v1962_v2, %s1891_s20  ;;  %v2102_v20 = vld [vmem:[%s3069_s0 + $0xd8] sm:$0xff]  ;;  %v2118_v22 = vld [vmem:[%s3069_s0 + $0x1b0] sm:$0xff] }
   0xb   :  { %585 = vrot.lane.b32.xlu2 %v1974_v4, %s1891_s20  ;;  %v2107_v21 = vld [vmem:[%s3069_s0 + $0x158] sm:$0xff]  ;;  %v2123_v23 = vld [vmem:[%s3069_s0 + $0x40] sm:$0xff]  ;;  %v871_v26 = vld [vmem:[%s3070_s1 + $0x10] sm:$0xff] }
   0xc   :  { %v873_v24 = vld [vmem:[%s3070_s1 + $0x20] sm:$0xf]  ;;  %v872_v25 = vld [vmem:[%s3070_s1 + $0x18] sm:$0xff]  ;;  %v870_v29 = vld [vmem:[%s3070_s1 + $0x8] sm:$0xff] }
   0xd   :  { %1832 = vmatpush.msk.msra.mxu1 %vm1071_vm0, %v873_v24  ;;  %1765 = vmatpush.msk.msra.mxu0 %vm1071_vm0, %v873_v24  ;;  %v2143_v27 = vld [vmem:[%s3069_s0 + $0x1c0] sm:$0xff]  ;;  %v2176_v34 = vld [vmem:[%s3069_s0 + $0x48] sm:$0xff]  ;;  %v2223_v48 = vld [vmem:[%s3069_s0 + $0x1d0] sm:$0xff] }
   0xe   :  { %1833 = vmatpush.msk.msra.mxu2 %vm1071_vm0, %v873_v24  ;;  %1834 = vmatpush.msk.msra.mxu3 %vm1071_vm0, %v873_v24  ;;  %v2148_v28 = vld [vmem:[%s3069_s0 + $0xe0] sm:$0xff]  ;;  %v2181_v35 = vld [vmem:[%s3069_s0 + $0x1c8] sm:$0xff]  ;;  %v2228_v49 = vld [vmem:[%s3069_s0 + $0x50] sm:$0xff] }
   0xf   :  { %1835 = vmatpush.msra.mxu1 %v872_v25  ;;  %1087 = vmatpush.msra.mxu0 %v872_v25  ;;  %v869_v30 = vld [vmem:[%s3070_s1] sm:$0xff]  ;;  %v2192_v37 = vld [vmem:[%s3069_s0 + $0xe8] sm:$0xff]  ;;  %v2233_v50 = vld [vmem:[%s3069_s0 + $0x90] sm:$0xff] }
  0x10   :  { %1836 = vmatpush.msra.mxu2 %v872_v25  ;;  %1837 = vmatpush.msra.mxu3 %v872_v25  ;;  %v2165_v32 = vld [vmem:[%s3069_s0 + $0x160] sm:$0xff]  ;;  %v2203_v41 = vld [vmem:[%s3069_s0 + $0x168] sm:$0xff]  ;;  %v2254_v59 = vld [vmem:[%s3069_s0 + $0xf0] sm:$0xff] }
  0x11   :  { %1838 = vmatpush.msra.mxu1 %v871_v26  ;;  %1088 = vmatpush.msra.mxu0 %v871_v26  ;;  %v2208_v42 = vld [vmem:[%s3069_s0 + $0x88] sm:$0xff]  ;;  %v33_v51 = vld [vmem:[%s3069_s0] sm:$0xff]  ;;  %v2259_v60 = vld [vmem:[%s3069_s0 + $0x170] sm:$0xff] }
  0x12   :  { %547 = vrot.lane.b32.xlu1 %v1985_v5, %s1891_s20  ;;  %291 = vrot.lane.b32.xlu0 %v1990_v6, %s1890_s13  ;;  %v34_v62 = vld [vmem:[%s3069_s0 + $0x8] sm:$0xff] }
  0x13   :  { %331 = vrot.lane.b32.xlu2 %v1969_v3, %s1890_s13  ;;  %1841 = vmatpush.msra.mxu1 %v870_v29 }
  0x14   :  { %1089 = vmatpush.msra.mxu0 %v870_v29  ;;  %1839 = vmatpush.msra.mxu2 %v871_v26 }
  0x15   :  { %1844 = vmatpush.msra.mxu1 %v869_v30  ;;  %1840 = vmatpush.msra.mxu3 %v871_v26 }
  0x16   :  { %1090 = vmatpush.msra.mxu0 %v869_v30  ;;  %1842 = vmatpush.msra.mxu2 %v870_v29 }
  0x17   :  { %1843 = vmatpush.msra.mxu3 %v870_v29 }
  0x18   :  { %1845 = vmatpush.msra.mxu2 %v869_v30 }
  0x19   :  { %1846 = vmatpush.msra.mxu3 %v869_v30  ;;  %v2280_v30 = vld [vmem:[%s3069_s0 + $0x58] sm:$0xff] }
  0x1a   :  { %293 = vrot.lane.b32.xlu1 %v2001_v7, %s1890_s13  ;;  %587 = vrot.lane.b32.xlu0 %v2006_v8, %s1891_s20 }
  0x1b   :  { %549 = vrot.lane.b32.xlu2 %v2011_v9, %s1891_s20 }
  0x22   :  { %589 = vrot.lane.b32.xlu1 %v2022_v10, %s1891_s20  ;;  %333 = vrot.lane.b32.xlu0 %v1974_v4, %s1890_s13 }
  0x23   :  { %357 = vrot.lane.b32.xlu2 %v2027_v11, %s1890_s13 }
  0x2a   :  { %295 = vrot.lane.b32.xlu1 %v1985_v5, %s1890_s13  ;;  %613 = vrot.lane.b32.xlu0 %v2038_v12, %s1891_s20 }
  0x2b   :  { %551 = vrot.lane.b32.xlu2 %v2043_v13, %s1891_s20 }
  0x32   :  { %591 = vrot.lane.b32.xlu1 %v2054_v14, %s1891_s20  ;;  %335 = vrot.lane.b32.xlu0 %v2006_v8, %s1890_s13 }
  0x33   :  { %359 = vrot.lane.b32.xlu2 %v2059_v15, %s1890_s13 }
  0x3a   :  { %297 = vrot.lane.b32.xlu1 %v2011_v9, %s1890_s13  ;;  %615 = vrot.lane.b32.xlu0 %v2070_v16, %s1891_s20 }
  0x3b   :  { %385 = vrot.lane.b32.xlu2 %v2075_v17, %s1890_s13 }
  0x42   :  { %641 = vrot.lane.b32.xlu1 %v2086_v18, %s1891_s20  ;;  %553 = vrot.lane.b32.xlu0 %v2091_v19, %s1891_s20 }
  0x43   :  { %337 = vrot.lane.b32.xlu2 %v2022_v10, %s1890_s13 }
  0x4a   :  { %361 = vrot.lane.b32.xlu1 %v2038_v12, %s1890_s13  ;;  %593 = vrot.lane.b32.xlu0 %v2102_v20, %s1891_s20 }
  0x4b   :  { %617 = vrot.lane.b32.xlu2 %v2107_v21, %s1891_s20 }
  0x52   :  { %387 = vrot.lane.b32.xlu1 %v2118_v22, %s1890_s13  ;;  %299 = vrot.lane.b32.xlu0 %v2043_v13, %s1890_s13 }
  0x53   :  { %555 = vrot.lane.b32.xlu2 %v2123_v23, %s1891_s20 }
  0x5a   :  { %339 = vrot.lane.b32.xlu1 %v2054_v14, %s1890_s13  ;;  %643 = vrot.lane.b32.xlu0 %v2143_v27, %s1891_s20 }
  0x5b   :  { %595 = vrot.lane.b32.xlu2 %v2148_v28, %s1891_s20 }
  0x5d   :  { %v330_v31 = vpop.permute.xlu2 %329 }
  0x5e   :  { %v759_v61 = vsel %vm739_vm1, %v1953_v1, %v330_v31 }
  0x62   :  { %619 = vrot.lane.b32.xlu1 %v2165_v32, %s1891_s20  ;;  %363 = vrot.lane.b32.xlu0 %v2070_v16, %s1890_s13 }
  0x63   :  { %301 = vrot.lane.b32.xlu2 %v2091_v19, %s1890_s13 }
  0x65   :  { %v586_v33 = vpop.permute.xlu2 %585 }
  0x66   :  { %v824_v26 = vsel %vm804_vm2, %v759_v61, %v586_v33 }
  0x6a   :  { %557 = vrot.lane.b32.xlu1 %v2176_v34, %s1891_s20  ;;  %389 = vrot.lane.b32.xlu0 %v2086_v18, %s1890_s13 }
  0x6b   :  { %645 = vrot.lane.b32.xlu2 %v2181_v35, %s1891_s20 }
  0x6d   :  { %v332_v36 = vpop.permute.xlu2 %331 }
  0x6e   :  { %v760_v31 = vsel %vm739_vm1, %v1948_v0, %v332_v36  ;;  %v66_v0 = vld [vmem:[%s3069_s0 + $0x128] sm:$0xff]  ;;  %v2298_v36 = vld [vmem:[%s3069_s0 + $0x1d8] sm:$0xff] }
  0x72   :  { %597 = vrot.lane.b32.xlu1 %v2192_v37, %s1891_s20  ;;  %341 = vrot.lane.b32.xlu0 %v2102_v20, %s1890_s13 }
  0x73   :  { %365 = vrot.lane.b32.xlu2 %v2107_v21, %s1890_s13 }
  0x74   :  { %v328_v38 = vpop.permute.xlu1 %327  ;;  %v326_v39 = vpop.permute.xlu0 %325 }
  0x75   :  { %v550_v40 = vpop.permute.xlu2 %549  ;;  %v757_v43 = vsel %vm739_vm1, %v2208_v42, %v326_v39  ;;  %v758_v52 = vsel %vm739_vm1, %v2233_v50, %v328_v38 }
  0x7a   :  { %303 = vrot.lane.b32.xlu1 %v2123_v23, %s1890_s13  ;;  %621 = vrot.lane.b32.xlu0 %v2203_v41, %s1891_s20 }
  0x7b   :  { %391 = vrot.lane.b32.xlu2 %v2143_v27, %s1890_s13 }
  0x7c   :  { %v584_v44 = vpop.permute.xlu1 %583  ;;  %v582_v45 = vpop.permute.xlu0 %581 }
  0x7d   :  { %v822_v46 = vsel %vm804_vm2, %v757_v43, %v582_v45  ;;  %v358_v47 = vpop.permute.xlu2 %357  ;;  %v823_v56 = vsel %vm804_vm2, %v758_v52, %v584_v44  ;;  %v2303_v43 = vld [vmem:[%s3069_s0 + $0xf8] sm:$0xff] }
  0x7e   :  { %1783 = vmatmul.msk.f32.vlgmr.msra.gmra.mxu1 %vm878_vm3, %v822_v46  ;;  %v773_v45 = vsel %vm739_vm1, %v66_v0, %v358_v47 }
  0x82   :  { %647 = vrot.lane.b32.xlu1 %v2223_v48, %s1891_s20  ;;  %559 = vrot.lane.b32.xlu0 %v2228_v49, %s1891_s20 }
  0x83   :  { %343 = vrot.lane.b32.xlu2 %v2148_v28, %s1890_s13 }
  0x84   :  { %v548_v53 = vpop.permute.xlu1 %547  ;;  %v292_v54 = vpop.permute.xlu0 %291 }
  0x85   :  { %v740_v55 = vsel %vm739_vm1, %v33_v51, %v292_v54  ;;  %v552_v57 = vpop.permute.xlu2 %551 }
  0x86   :  { %1784 = vmatmul.msk.f32.gmra.mxu1 %vm878_vm3, %v823_v56  ;;  %v805_v58 = vsel %vm804_vm2, %v740_v55, %v548_v53  ;;  %v2325_v55 = vld [vmem:[%s3069_s0 + $0x178] sm:$0xff] }
  0x87   :  { %1766 = vmatmul.msk.f32.vlgmr.msra.gmra.mxu0 %vm878_vm3, %v805_v58 }
  0x8a   :  { %367 = vrot.lane.b32.xlu1 %v2165_v32, %s1890_s13  ;;  %599 = vrot.lane.b32.xlu0 %v2254_v59, %s1891_s20 }
  0x8b   :  { %623 = vrot.lane.b32.xlu2 %v2259_v60, %s1891_s20 }
  0x8c   :  { %v294_v63 = vpop.permute.xlu1 %293  ;;  %v588_v24 = vpop.permute.xlu0 %587 }
  0x8d   :  { %v741_v25 = vsel %vm739_vm1, %v34_v62, %v294_v63  ;;  %v360_v1 = vpop.permute.xlu2 %359  ;;  %v825_v39 = vsel %vm804_vm2, %v760_v31, %v588_v24  ;;  %v2339_v62 = vld [vmem:[%s3069_s0 + $0x130] sm:$0xff]  ;;  %v2345_v63 = vld [vmem:[%s3069_s0 + $0x60] sm:$0xff] }
  0x8e   :  { %1785 = vmatmul.msk.f32.gmra.mxu1 %vm878_vm3, %v824_v26  ;;  %v806_v29 = vsel %vm804_vm2, %v741_v25, %v550_v40  ;;  %v2350_v24 = vld [vmem:[%s3069_s0 + $0x1e0] sm:$0xff] }
  0x8f   :  { %1767 = vmatmul.msk.f32.gmra.mxu0 %vm878_vm3, %v806_v29 }
  0x92   :  { %393 = vrot.lane.b32.xlu1 %v2181_v35, %s1890_s13  ;;  %305 = vrot.lane.b32.xlu0 %v2176_v34, %s1890_s13 }
  0x93   :  { %561 = vrot.lane.b32.xlu2 %v2280_v30, %s1891_s20 }
  0x94   :  { %v590_v33 = vpop.permute.xlu1 %589  ;;  %v334_v38 = vpop.permute.xlu0 %333 }
  0x95   :  { %v386_v40 = vpop.permute.xlu2 %385  ;;  %v761_v44 = vsel %vm739_vm1, %v1962_v2, %v334_v38 }
  0x96   :  { %1786 = vmatmul.msk.f32.gmra.mxu1 %vm878_vm3, %v825_v39  ;;  %v826_v53 = vsel %vm804_vm2, %v761_v44, %v590_v33  ;;  %v2370_v33 = vld [vmem:[%s3069_s0 + $0x100] sm:$0xff] }
  0x9a   :  { %345 = vrot.lane.b32.xlu1 %v2192_v37, %s1890_s13  ;;  %649 = vrot.lane.b32.xlu0 %v2298_v36, %s1891_s20 }
  0x9b   :  { %601 = vrot.lane.b32.xlu2 %v2303_v43, %s1891_s20 }
  0x9c   :  { %v296_v46 = vpop.permute.xlu1 %295  ;;  %v614_v51 = vpop.permute.xlu0 %613 }
  0x9d   :  { %v742_v52 = vsel %vm739_vm1, %v1990_v6, %v296_v46  ;;  %v838_v2 = vsel %vm804_vm2, %v773_v45, %v614_v51  ;;  %v338_v54 = vpop.permute.xlu2 %337 }
  0x9e   :  { %1787 = vmatmul.msk.f32.gmra.mxu1 %vm878_vm3, %v826_v53  ;;  %1799 = vmatmul.msk.f32.vlgmr.msra.gmra.mxu2 %vm878_vm3, %v838_v2  ;;  %v807_v47 = vsel %vm804_vm2, %v742_v52, %v552_v57  ;;  %v763_v52 = vsel %vm739_vm1, %v1974_v4, %v338_v54  ;;  %v2408_v54 = vld [vmem:[%s3069_s0 + $0x1e8] sm:$0xff] }
  0x9f   :  { %1768 = vmatmul.msk.f32.gmra.mxu0 %vm878_vm3, %v807_v47 }
  0xa2   :  { %625 = vrot.lane.b32.xlu1 %v2325_v55, %s1891_s20  ;;  %369 = vrot.lane.b32.xlu0 %v2203_v41, %s1890_s13 }
  0xa3   :  { %307 = vrot.lane.b32.xlu2 %v2228_v49, %s1890_s13 }
  0xa4   :  { %v592_v6 = vpop.permute.xlu1 %591  ;;  %v336_v56 = vpop.permute.xlu0 %335 }
  0xa5   :  { %v762_v57 = vsel %vm739_vm1, %v1969_v3, %v336_v56  ;;  %v618_v58 = vpop.permute.xlu2 %617  ;;  %v774_v3 = vsel %vm739_vm1, %v2339_v62, %v360_v1  ;;  %v2365_v1 = vld [vmem:[%s3069_s0 + $0x198] sm:$0xff]  ;;  %v2413_v56 = vld [vmem:[%s3069_s0 + $0x68] sm:$0xff] }
  0xa6   :  { %v827_v61 = vsel %vm804_vm2, %v762_v57, %v592_v6  ;;  %v787_v38 = vsel %vm739_vm1, %v2365_v1, %v386_v40  ;;  %v2389_v40 = vld [vmem:[%s3069_s0 + $0x180] sm:$0xff] }
  0xa7   :  { %1788 = vmatmul.msk.f32.gmra.mxu1 %vm878_vm3, %v827_v61 }
  0xaa   :  { %563 = vrot.lane.b32.xlu1 %v2345_v63, %s1891_s20  ;;  %395 = vrot.lane.b32.xlu0 %v2223_v48, %s1890_s13 }
  0xab   :  { %651 = vrot.lane.b32.xlu2 %v2350_v24, %s1891_s20 }
  0xac   :  { %v298_v25 = vpop.permute.xlu1 %297  ;;  %v616_v26 = vpop.permute.xlu0 %615 }
  0xad   :  { %v839_v29 = vsel %vm804_vm2, %v774_v3, %v616_v26  ;;  %v556_v31 = vpop.permute.xlu2 %555  ;;  %v743_v39 = vsel %vm739_vm1, %v2001_v7, %v298_v25  ;;  %v2428_v25 = vld [vmem:[%s3069_s0 + $0x108] sm:$0xff] }
  0xae   :  { %1800 = vmatmul.msk.f32.gmra.mxu2 %vm878_vm3, %v839_v29  ;;  %v2433_v26 = vld [vmem:[%s3069_s0 + $0x188] sm:$0xff]  ;;  %v2438_v29 = vld [vmem:[%s3069_s0 + $0x1a0] sm:$0xff] }
  0xb2   :  { %603 = vrot.lane.b32.xlu1 %v2370_v33, %s1891_s20  ;;  %347 = vrot.lane.b32.xlu0 %v2254_v59, %s1890_s13 }
  0xb3   :  { %371 = vrot.lane.b32.xlu2 %v2259_v60, %s1890_s13 }
  0xb4   :  { %v642_v0 = vpop.permute.xlu1 %641  ;;  %v554_v44 = vpop.permute.xlu0 %553 }
  0xb5   :  { %v808_v45 = vsel %vm804_vm2, %v743_v39, %v554_v44  ;;  %v852_v46 = vsel %vm804_vm2, %v787_v38, %v642_v0  ;;  %v596_v51 = vpop.permute.xlu2 %595 }
  0xb6   :  { %1769 = vmatmul.msk.f32.gmra.mxu0 %vm878_vm3, %v808_v45  ;;  %1813 = vmatmul.msk.f32.vlgmr.msra.gmra.mxu3 %vm878_vm3, %v852_v46  ;;  %v2457_v46 = vld [vmem:[%s3069_s0 + $0x70] sm:$0xff] }
  0xba   :  { %309 = vrot.lane.b32.xlu1 %v2280_v30, %s1890_s13  ;;  %627 = vrot.lane.b32.xlu0 %v2389_v40, %s1891_s20 }
  0xbb   :  { %397 = vrot.lane.b32.xlu2 %v2298_v36, %s1890_s13 }
  0xbc   :  { %v362_v7 = vpop.permute.xlu1 %361  ;;  %v594_v53 = vpop.permute.xlu0 %593 }
  0xbd   :  { %v775_v2 = vsel %vm739_vm1, %v2027_v11, %v362_v7  ;;  %v828_v47 = vsel %vm804_vm2, %v763_v52, %v594_v53  ;;  %v302_v6 = vpop.permute.xlu2 %301 }
  0xbe   :  { %1789 = vmatmul.msk.f32.gmra.mxu1 %vm878_vm3, %v828_v47  ;;  %v840_v4 = vsel %vm804_vm2, %v775_v2, %v618_v58  ;;  %v2472_v2 = vld [vmem:[%s3069_s0 + $0x1f0] sm:$0xff] }
  0xbf   :  { %1801 = vmatmul.msk.f32.gmra.mxu2 %vm878_vm3, %v840_v4  ;;  %v1731_v47 = vld [vmem:[%s3069_s0 + $0x110] sm:$0xff]  ;;  %v745_v4 = vsel %vm739_vm1, %v2011_v9, %v302_v6 }
  0xc2   :  { %653 = vrot.lane.b32.xlu1 %v2408_v54, %s1891_s20  ;;  %565 = vrot.lane.b32.xlu0 %v2413_v56, %s1891_s20 }
  0xc3   :  { %349 = vrot.lane.b32.xlu2 %v2303_v43, %s1890_s13 }
  0xc4   :  { %v388_v11 = vpop.permute.xlu1 %387  ;;  %v300_v57 = vpop.permute.xlu0 %299 }
  0xc5   :  { %v744_v58 = vsel %vm739_vm1, %v1985_v5, %v300_v57  ;;  %v646_v61 = vpop.permute.xlu2 %645  ;;  %v788_v5 = vsel %vm739_vm1, %v2438_v29, %v388_v11 }
  0xc6   :  { %v809_v3 = vsel %vm804_vm2, %v744_v58, %v556_v31 }
  0xc7   :  { %1770 = vmatmul.msk.f32.gmra.mxu0 %vm878_vm3, %v809_v3 }
  0xca   :  { %373 = vrot.lane.b32.xlu1 %v2325_v55, %s1890_s13  ;;  %605 = vrot.lane.b32.xlu0 %v2428_v25, %s1891_s20 }
  0xcb   :  { %629 = vrot.lane.b32.xlu2 %v2433_v26, %s1891_s20 }
  0xcc   :  { %v340_v31 = vpop.permute.xlu1 %339  ;;  %v644_v38 = vpop.permute.xlu0 %643 }
  0xcd   :  { %v764_v39 = vsel %vm739_vm1, %v2006_v8, %v340_v31  ;;  %v853_v0 = vsel %vm804_vm2, %v788_v5, %v644_v38  ;;  %v366_v44 = vpop.permute.xlu2 %365 }
  0xce   :  { %1814 = vmatmul.msk.f32.gmra.mxu3 %vm878_vm3, %v853_v0  ;;  %v829_v45 = vsel %vm804_vm2, %v764_v39, %v596_v51  ;;  %v2508_v0 = vld [vmem:[%s3069_s0 + $0x78] sm:$0xff] }
  0xcf   :  { %1790 = vmatmul.msk.f32.gmra.mxu1 %vm878_vm3, %v829_v45  ;;  %v2513_v45 = vld [vmem:[%s3069_s0 + $0x1f8] sm:$0xff] }
  0xd2   :  { %399 = vrot.lane.b32.xlu1 %v2350_v24, %s1890_s13  ;;  %311 = vrot.lane.b32.xlu0 %v2345_v63, %s1890_s13 }
  0xd3   :  { %567 = vrot.lane.b32.xlu2 %v2457_v46, %s1891_s20 }
  0xd4   :  { %v620_v8 = vpop.permute.xlu1 %619  ;;  %v364_v52 = vpop.permute.xlu0 %363 }
  0xd5   :  { %v776_v51 = vsel %vm739_vm1, %v2059_v15, %v364_v52  ;;  %v392_v7 = vpop.permute.xlu2 %391 }
  0xd6   :  { %v841_v53 = vsel %vm804_vm2, %v776_v51, %v620_v8  ;;  %v777_v8 = vsel %vm739_vm1, %v2038_v12, %v366_v44  ;;  %v1732_v12 = vld [vmem:[%s3069_s0 + $0x118] sm:$0xff]  ;;  %v790_v44 = vsel %vm739_vm1, %v2118_v22, %v392_v7 }
  0xd7   :  { %1802 = vmatmul.msk.f32.gmra.mxu2 %vm878_vm3, %v841_v53 }
  0xda   :  { %351 = vrot.lane.b32.xlu1 %v2370_v33, %s1890_s13  ;;  %655 = vrot.lane.b32.xlu0 %v2472_v2, %s1891_s20  ;;  %v2493_v33 = vld [vmem:[%s3069_s0 + $0x190] sm:$0xff] }
  0xdb   :  { %607 = vrot.lane.b32.xlu2 %v1731_v47, %s1891_s20 }
  0xdc   :  { %v558_v11 = vpop.permute.xlu1 %557  ;;  %v390_v57 = vpop.permute.xlu0 %389 }
  0xdd   :  { %v789_v58 = vsel %vm739_vm1, %v2075_v17, %v390_v57  ;;  %v810_v3 = vsel %vm804_vm2, %v745_v4, %v558_v11  ;;  %v344_v5 = vpop.permute.xlu2 %343 }
  0xde   :  { %1771 = vmatmul.msk.f32.gmra.mxu0 %vm878_vm3, %v810_v3  ;;  %v854_v9 = vsel %vm804_vm2, %v789_v58, %v646_v61  ;;  %v766_v22 = vsel %vm739_vm1, %v2054_v14, %v344_v5  ;;  %v2558_v5 = vld [vmem:[%s3069_s0 + $0x200] sm:$0xff] }
  0xdf   :  { %1815 = vmatmul.msk.f32.gmra.mxu3 %vm878_vm3, %v854_v9 }
  0xe2   :  { %631 = vrot.lane.b32.xlu1 %v2493_v33, %s1891_s20  ;;  %375 = vrot.lane.b32.xlu0 %v2389_v40, %s1890_s13 }
  0xe3   :  { %313 = vrot.lane.b32.xlu2 %v2413_v56, %s1890_s13 }
  0xe4   :  { %v598_v6 = vpop.permute.xlu1 %597  ;;  %v342_v31 = vpop.permute.xlu0 %341 }
  0xe5   :  { %v765_v61 = vsel %vm739_vm1, %v2022_v10, %v342_v31  ;;  %v624_v38 = vpop.permute.xlu2 %623  ;;  %v2563_v31 = vld [vmem:[%s3069_s0 + $0x80] sm:$0xff] }
  0xe6   :  { %v830_v39 = vsel %vm804_vm2, %v765_v61, %v598_v6 }
  0xe7   :  { %1791 = vmatmul.msk.f32.gmra.mxu1 %vm878_vm3, %v830_v39 }
  0xea   :  { %569 = vrot.lane.b32.xlu1 %v2508_v0, %s1891_s20  ;;  %401 = vrot.lane.b32.xlu0 %v2408_v54, %s1890_s13 }
  0xeb   :  { %657 = vrot.lane.b32.xlu2 %v2513_v45, %s1891_s20 }
  0xec   :  { %v304_v10 = vpop.permute.xlu1 %303  ;;  %v622_v52 = vpop.permute.xlu0 %621 }
  0xed   :  { %v842_v51 = vsel %vm804_vm2, %v777_v8, %v622_v52  ;;  %v562_v53 = vpop.permute.xlu2 %561  ;;  %v746_v47 = vsel %vm739_vm1, %v2043_v13, %v304_v10  ;;  %v2578_v52 = vld [vmem:[%s3071_s2] ss:$0 sm:$0xff] }
  0xee   :  { %1803 = vmatmul.msk.f32.gmra.mxu2 %vm878_vm3, %v842_v51 }
  0xf2   :  { %609 = vrot.lane.b32.xlu1 %v1732_v12, %s1891_s20  ;;  %353 = vrot.lane.b32.xlu0 %v2428_v25, %s1890_s13 }
  0xf3   :  { %377 = vrot.lane.b32.xlu2 %v2433_v26, %s1890_s13 }
  0xf4   :  { %v648_v4 = vpop.permute.xlu1 %647  ;;  %v560_v11 = vpop.permute.xlu0 %559 }
  0xf5   :  { %v811_v57 = vsel %vm804_vm2, %v746_v47, %v560_v11  ;;  %v855_v58 = vsel %vm804_vm2, %v790_v44, %v648_v4  ;;  %v602_v3 = vpop.permute.xlu2 %601 }
  0xf6   :  { %1772 = vmatmul.msk.f32.gmra.mxu0 %vm878_vm3, %v811_v57  ;;  %1816 = vmatmul.msk.f32.gmra.mxu3 %vm878_vm3, %v855_v58 }
  0xfa   :  { %315 = vrot.lane.b32.xlu1 %v2457_v46, %s1890_s13  ;;  %633 = vrot.lane.b32.xlu0 %v2365_v1, %s1891_s20 }
  0xfb   :  { %403 = vrot.lane.b32.xlu2 %v2472_v2, %s1890_s13 }
  0xfc   :  { %v368_v13 = vpop.permute.xlu1 %367  ;;  %v600_v25 = vpop.permute.xlu0 %599 }
  0xfd   :  { %v778_v7 = vsel %vm739_vm1, %v2070_v16, %v368_v13  ;;  %v831_v9 = vsel %vm804_vm2, %v766_v22, %v600_v25  ;;  %v308_v6 = vpop.permute.xlu2 %307 }
  0xfe   :  { %1792 = vmatmul.msk.f32.gmra.mxu1 %vm878_vm3, %v831_v9  ;;  %v843_v14 = vsel %vm804_vm2, %v778_v7, %v624_v38 }
  0xff   :  { %1804 = vmatmul.msk.f32.gmra.mxu2 %vm878_vm3, %v843_v14  ;;  %v2611_v14 = vld [vmem:[%s3069_s0 + $0x208] sm:$0xff] }
 0x102   :  { %659 = vrot.lane.b32.xlu1 %v2558_v5, %s1891_s20  ;;  %571 = vrot.lane.b32.xlu0 %v2563_v31, %s1891_s20 }
 0x103   :  { %355 = vrot.lane.b32.xlu2 %v2339_v62, %s1890_s13 }
 0x104   :  { %v394_v16 = vpop.permute.xlu1 %393  ;;  %v306_v61 = vpop.permute.xlu0 %305 }
 0x105   :  { %v747_v38 = vsel %vm739_vm1, %v2091_v19, %v306_v61  ;;  %v1092_v39 = vpop.f32.mrf.mxu0  ;;  %v652_v8 = vpop.permute.xlu2 %651  ;;  %v791_v19 = vsel %vm739_vm1, %v2086_v18, %v394_v16  ;;  %v748_v16 = vsel %vm739_vm1, %v2123_v23, %v308_v6 }
 0x106   :  { %v812_v10 = vsel %vm804_vm2, %v747_v38, %v562_v53  ;;  %v1093_v51 = vadd.f32 %v2578_v52, %v1092_v39 }
 0x107   :  { %1773 = vmatmul.msk.f32.gmra.mxu0 %vm878_vm3, %v812_v10 }
 0x108   :  { %v1284_v11 = vmax.f32 %v1093_v51, 0.0 }
 0x10a   :  { %379 = vrot.lane.b32.xlu1 %v2493_v33, %s1890_s13  ;;  %611 = vrot.lane.b32.xlu0 %v2059_v15, %s1891_s20  ;;  %v1349_v18 = vsel %vm1348_vm4, %v1284_v11, 0.0 }
 0x10b   :  { %635 = vrot.lane.b32.xlu2 %v2438_v29, %s1891_s20 }
 0x10c   :  { %v346_v62 = vpop.permute.xlu1 %345  ;;  %v650_v53 = vpop.permute.xlu0 %649 }
 0x10d   :  { %v767_v12 = vsel %vm739_vm1, %v2102_v20, %v346_v62  ;;  %v1095_v44 = vpop.f32.mrf.mxu0  ;;  %v856_v47 = vsel %vm804_vm2, %v791_v19, %v650_v53  ;;  %v372_v4 = vpop.permute.xlu2 %371 }
 0x10e   :  { %v1096_v57 = vadd.f32 %v2578_v52, %v1095_v44  ;;  %1817 = vmatmul.msk.f32.gmra.mxu3 %vm878_vm3, %v856_v47  ;;  %v832_v15 = vsel %vm804_vm2, %v767_v12, %v602_v3  ;;  %v2642_v44 = vld [vmem:[%s3069_s0 + $0x210] sm:$0xff]  ;;  %v780_v11 = vsel %vm739_vm1, %v2165_v32, %v372_v4 }
 0x10f   :  { %1793 = vmatmul.msk.f32.gmra.mxu1 %vm878_vm3, %v832_v15  ;;  %v1747_v47 = vld [vmem:[%s3069_s0 + $0x1b0] sm:$0xff] }
 0x110   :  { %v1285_v58 = vmax.f32 %v1096_v57, 0.0 }
 0x112   :  { %v1350_v22 = vsel %vm1348_vm4, %v1285_v58, 0.0  ;;  %405 = vrot.lane.b32.xlu1 %v2513_v45, %s1890_s13  ;;  %317 = vrot.lane.b32.xlu0 %v2508_v0, %s1890_s13 }
 0x113   :  { %v1351_v20 = vadd.f32 %v1350_v22, %v1349_v18  ;;  %573 = vrot.lane.b32.xlu2 %v2208_v42, %s1891_s20  ;;  %v1716_v18 = vld [vmem:[%s3069_s0 + $0x98] sm:$0xff] }
 0x114   :  { %v626_v13 = vpop.permute.xlu1 %625  ;;  %v370_v3 = vpop.permute.xlu0 %369 }
 0x115   :  { %v779_v25 = vsel %vm739_vm1, %v2107_v21, %v370_v3  ;;  %v398_v7 = vpop.permute.xlu2 %397 }
 0x116   :  { %v844_v9 = vsel %vm804_vm2, %v779_v25, %v626_v13  ;;  %v793_v32 = vsel %vm739_vm1, %v2181_v35, %v398_v7 }
 0x117   :  { %1805 = vmatmul.msk.f32.gmra.mxu2 %vm878_vm3, %v844_v9 }
 0x11a   :  { %381 = vrot.lane.b32.xlu1 %v2365_v1, %s1890_s13  ;;  %661 = vrot.lane.b32.xlu0 %v2611_v14, %s1891_s20 }
 0x11b   :  { %637 = vrot.lane.b32.xlu2 %v2075_v17, %s1891_s20 }
 0x11c   :  { %v564_v21 = vpop.permute.xlu1 %563  ;;  %v396_v61 = vpop.permute.xlu0 %395 }
 0x11d   :  { %v792_v38 = vsel %vm739_vm1, %v2143_v27, %v396_v61  ;;  %v1098_v39 = vpop.f32.mrf.mxu0  ;;  %v813_v10 = vsel %vm804_vm2, %v748_v16, %v564_v21  ;;  %v350_v51 = vpop.permute.xlu2 %349 }
 0x11e   :  { %v1099_v23 = vadd.f32 %v2578_v52, %v1098_v39  ;;  %1774 = vmatmul.msk.f32.gmra.mxu0 %vm878_vm3, %v813_v10  ;;  %v857_v1 = vsel %vm804_vm2, %v792_v38, %v652_v8  ;;  %v769_v16 = vsel %vm739_vm1, %v2192_v37, %v350_v51  ;;  %v1717_v10 = vld [vmem:[%s3069_s0 + $0xa0] sm:$0xff] }
 0x11f   :  { %1818 = vmatmul.msk.f32.gmra.mxu3 %vm878_vm3, %v857_v1 }
 0x120   :  { %v1286_v6 = vmax.f32 %v1099_v23, 0.0 }
 0x122   :  { %v1352_v17 = vsel %vm1348_vm4, %v1286_v6, 0.0  ;;  %407 = vrot.lane.b32.xlu1 %v2558_v5, %s1890_s13  ;;  %319 = vrot.lane.b32.xlu0 %v2563_v31, %s1890_s13 }
 0x123   :  { %v1353_v27 = vadd.f32 %v1352_v17, %v1351_v20  ;;  %575 = vrot.lane.b32.xlu2 %v2233_v50, %s1891_s20 }
 0x124   :  { %v604_v19 = vpop.permute.xlu1 %603  ;;  %v348_v62 = vpop.permute.xlu0 %347 }
 0x125   :  { %v768_v8 = vsel %vm739_vm1, %v2148_v28, %v348_v62  ;;  %v630_v53 = vpop.permute.xlu2 %629 }
 0x126   :  { %v833_v12 = vsel %vm804_vm2, %v768_v8, %v604_v19  ;;  %v1762_v19 = vld [vmem:[%s3069_s0 + $0x228] sm:$0xff] }
 0x127   :  { %1794 = vmatmul.msk.f32.gmra.mxu1 %vm878_vm3, %v833_v12 }
 0x12a   :  { %383 = vrot.lane.b32.xlu1 %v2438_v29, %s1890_s13  ;;  %663 = vrot.lane.b32.xlu0 %v2642_v44, %s1891_s20 }
 0x12b   :  { %639 = vrot.lane.b32.xlu2 %v1747_v47, %s1891_s20 }
 0x12c   :  { %v310_v28 = vpop.permute.xlu1 %309  ;;  %v628_v57 = vpop.permute.xlu0 %627 }
 0x12d   :  { %v845_v15 = vsel %vm804_vm2, %v780_v11, %v628_v57  ;;  %v568_v58 = vpop.permute.xlu2 %567  ;;  %v749_v4 = vsel %vm739_vm1, %v2176_v34, %v310_v28 }
 0x12e   :  { %1806 = vmatmul.msk.f32.gmra.mxu2 %vm878_vm3, %v845_v15 }
 0x132   :  { %409 = vrot.lane.b32.xlu1 %v2611_v14, %s1890_s13  ;;  %321 = vrot.lane.b32.xlu0 %v2208_v42, %s1890_s13  ;;  %v2676_v42 = vld [vmem:[%s3069_s0 + $0x218] sm:$0xff] }
 0x133   :  { %v1101_v29 = vpop.f32.mrf.mxu0  ;;  %577 = vrot.lane.b32.xlu2 %v1716_v18, %s1891_s20  ;;  %v1764_v18 = vld [vmem:[%s3069_s0 + $0x238] sm:$0xff] }
 0x134   :  { %v1102_v22 = vadd.f32 %v2578_v52, %v1101_v29  ;;  %v654_v20 = vpop.permute.xlu1 %653  ;;  %v566_v13 = vpop.permute.xlu0 %565 }
 0x135   :  { %v814_v3 = vsel %vm804_vm2, %v749_v4, %v566_v13  ;;  %v858_v35 = vsel %vm804_vm2, %v793_v32, %v654_v20  ;;  %v608_v25 = vpop.permute.xlu2 %607 }
 0x136   :  { %v1287_v7 = vmax.f32 %v1102_v22, 0.0  ;;  %1775 = vmatmul.msk.f32.gmra.mxu0 %vm878_vm3, %v814_v3  ;;  %1819 = vmatmul.msk.f32.gmra.mxu3 %vm878_vm3, %v858_v35 }
 0x138   :  { %v1354_v34 = vsel %vm1348_vm4, %v1287_v7, 0.0 }
 0x139   :  { %v1355_v9 = vadd.f32 %v1354_v34, %v1353_v27 }
 0x13a   :  { %323 = vrot.lane.b32.xlu1 %v2233_v50, %s1890_s13  ;;  %665 = vrot.lane.b32.xlu0 %v2676_v42, %s1891_s20  ;;  %v1761_v50 = vld [vmem:[%s3069_s0 + $0x220] sm:$0xff] }
 0x13b   :  { %411 = vrot.lane.b32.xlu2 %v2642_v44, %s1890_s13 }
 0x13c   :  { %v374_v21 = vpop.permute.xlu1 %373  ;;  %v606_v61 = vpop.permute.xlu0 %605 }
 0x13d   :  { %v781_v38 = vsel %vm739_vm1, %v2203_v41, %v374_v21  ;;  %v834_v39 = vsel %vm804_vm2, %v769_v16, %v606_v61  ;;  %v314_v51 = vpop.permute.xlu2 %313 }
 0x13e   :  { %1795 = vmatmul.msk.f32.gmra.mxu1 %vm878_vm3, %v834_v39  ;;  %v846_v37 = vsel %vm804_vm2, %v781_v38, %v630_v53  ;;  %v751_v22 = vsel %vm739_vm1, %v2280_v30, %v314_v51 }
 0x13f   :  { %1807 = vmatmul.msk.f32.gmra.mxu2 %vm878_vm3, %v846_v37 }
 0x142   :  { %667 = vrot.lane.b32.xlu1 %v1761_v50, %s1891_s20  ;;  %579 = vrot.lane.b32.xlu0 %v1717_v10, %s1891_s20 }
 0x143   :  { %413 = vrot.lane.b32.xlu2 %v2676_v42, %s1890_s13 }
 0x144   :  { %v400_v41 = vpop.permute.xlu1 %399  ;;  %v312_v23 = vpop.permute.xlu0 %311 }
 0x145   :  { %v750_v1 = vsel %vm739_vm1, %v2228_v49, %v312_v23  ;;  %v1104_v6 = vpop.f32.mrf.mxu0  ;;  %v658_v8 = vpop.permute.xlu2 %657  ;;  %v1763_v49 = vld [vmem:[%s3069_s0 + $0x230] sm:$0xff]  ;;  %v794_v47 = vsel %vm739_vm1, %v2223_v48, %v400_v41 }
 0x146   :  { %v1105_v17 = vadd.f32 %v2578_v52, %v1104_v6  ;;  %v815_v27 = vsel %vm804_vm2, %v750_v1, %v568_v58 }
 0x147   :  { %1776 = vmatmul.msk.f32.gmra.mxu0 %vm878_vm3, %v815_v27 }
 0x148   :  { %v1288_v62 = vmax.f32 %v1105_v17, 0.0 }
 0x14a   :  { %v1356_v53 = vsel %vm1348_vm4, %v1288_v62, 0.0  ;;  %669 = vrot.lane.b32.xlu0 %v1762_v19, %s1891_s20  ;;  %415 = vrot.lane.b32.xlu1 %v1761_v50, %s1890_s13 }
 0x14b   :  { %v1357_v12 = vadd.f32 %v1356_v53, %v1355_v9  ;;  %671 = vrot.lane.b32.xlu2 %v1763_v49, %s1891_s20 }
 0x14c   :  { %v352_v11 = vpop.permute.xlu1 %351  ;;  %v656_v28 = vpop.permute.xlu0 %655 }
 0x14d   :  { %v770_v57 = vsel %vm739_vm1, %v2254_v59, %v352_v11  ;;  %v859_v15 = vsel %vm804_vm2, %v794_v47, %v656_v28  ;;  %v378_v48 = vpop.permute.xlu2 %377 }
 0x14e   :  { %1820 = vmatmul.msk.f32.gmra.mxu3 %vm878_vm3, %v859_v15  ;;  %v835_v58 = vsel %vm804_vm2, %v770_v57, %v608_v25  ;;  %v783_v37 = vsel %vm739_vm1, %v2325_v55, %v378_v48  ;;  %v65_v55 = vld [vmem:[%s3069_s0 + $0x120] sm:$0xff] }
 0x14f   :  { %1796 = vmatmul.msk.f32.gmra.mxu1 %vm878_vm3, %v835_v58 }
 0x152   :  { %417 = vrot.lane.b32.xlu0 %v1762_v19, %s1890_s13  ;;  %673 = vrot.lane.b32.xlu1 %v1764_v18, %s1891_s20  ;;  %v2766_v19 = vpop.f32.mrf.mxu1 }
 0x154   :  { %v632_v32 = vpop.permute.xlu1 %631  ;;  %v376_v29 = vpop.permute.xlu0 %375 }
 0x155   :  { %v782_v59 = vsel %vm739_vm1, %v2259_v60, %v376_v29  ;;  %v404_v34 = vpop.permute.xlu2 %403 }
 0x156   :  { %v847_v4 = vsel %vm804_vm2, %v782_v59, %v632_v32  ;;  %v796_v23 = vsel %vm739_vm1, %v2350_v24, %v404_v34 }
 0x157   :  { %1808 = vmatmul.msk.f32.gmra.mxu2 %vm878_vm3, %v847_v4 }
 0x15a   :  { %v2775_v47 = vpop.f32.mrf.mxu1 }
 0x15b   :  { %v1107_v20 = vpop.f32.mrf.mxu0 }
 0x15c   :  { %v1108_v13 = vadd.f32 %v2578_v52, %v1107_v20  ;;  %v570_v3 = vpop.permute.xlu1 %569  ;;  %v402_v35 = vpop.permute.xlu0 %401 }
 0x15d   :  { %v795_v25 = vsel %vm739_vm1, %v2298_v36, %v402_v35  ;;  %v816_v7 = vsel %vm804_vm2, %v751_v22, %v570_v3  ;;  %v356_v39 = vpop.permute.xlu2 %355 }
 0x15e   :  { %v1289_v9 = vmax.f32 %v1108_v13, 0.0  ;;  %1777 = vmatmul.msk.f32.gmra.mxu0 %vm878_vm3, %v816_v7  ;;  %v860_v60 = vsel %vm804_vm2, %v795_v25, %v658_v8  ;;  %v772_v24 = vsel %vm739_vm1, %v65_v55, %v356_v39 }
 0x15f   :  { %1821 = vmatmul.msk.f32.gmra.mxu3 %vm878_vm3, %v860_v60 }
 0x160   :  { %v1358_v30 = vsel %vm1348_vm4, %v1289_v9, 0.0 }
 0x161   :  { %v2745_v16 = vadd.f32 %v1358_v30, %v1357_v12 }
 0x162   :  { %v2783_v32 = vpop.f32.mrf.mxu1 }
 0x164   :  { %v610_v21 = vpop.permute.xlu1 %609  ;;  %v354_v61 = vpop.permute.xlu0 %353 }
 0x165   :  { %v771_v38 = vsel %vm739_vm1, %v2303_v43, %v354_v61  ;;  %v636_v41 = vpop.permute.xlu2 %635 }
 0x166   :  { %v836_v36 = vsel %vm804_vm2, %v771_v38, %v610_v21 }
 0x167   :  { %1797 = vmatmul.msk.f32.gmra.mxu1 %vm878_vm3, %v836_v36 }
 0x16a   :  { %v2794_v3 = vpop.f32.mrf.mxu1 }
 0x16c   :  { %v316_v50 = vpop.permute.xlu1 %315  ;;  %v634_v10 = vpop.permute.xlu0 %633 }
 0x16d   :  { %v848_v51 = vsel %vm804_vm2, %v783_v37, %v634_v10  ;;  %v752_v43 = vsel %vm739_vm1, %v2345_v63, %v316_v50  ;;  %v574_v62 = vpop.permute.xlu2 %573 }
 0x16e   :  { %1809 = vmatmul.msk.f32.gmra.mxu2 %vm878_vm3, %v848_v51 }
 0x172   :  { %v2805_v60 = vpop.f32.mrf.mxu1 }
 0x174   :  { %v660_v1 = vpop.permute.xlu1 %659  ;;  %v572_v6 = vpop.permute.xlu0 %571 }
 0x175   :  { %v817_v17 = vsel %vm804_vm2, %v752_v43, %v572_v6  ;;  %v861_v27 = vsel %vm804_vm2, %v796_v23, %v660_v1  ;;  %v638_v15 = vpop.permute.xlu2 %637 }
 0x176   :  { %1778 = vmatmul.msk.f32.gmra.mxu0 %vm878_vm3, %v817_v17  ;;  %1822 = vmatmul.msk.f32.gmra.mxu3 %vm878_vm3, %v861_v27  ;;  %v1191_v17 = vpop.f32.mrf.mxu2 }
 0x17c   :  { %v380_v63 = vpop.permute.xlu1 %379  ;;  %v612_v8 = vpop.permute.xlu0 %611 }
 0x17d   :  { %v784_v53 = vsel %vm739_vm1, %v2389_v40, %v380_v63  ;;  %v837_v49 = vsel %vm804_vm2, %v772_v24, %v612_v8  ;;  %v576_v4 = vpop.permute.xlu2 %575 }
 0x17e   :  { %1798 = vmatmul.msk.f32.gmra.mxu1 %vm878_vm3, %v837_v49  ;;  %v849_v12 = vsel %vm804_vm2, %v784_v53, %v636_v41 }
 0x17f   :  { %1810 = vmatmul.msk.f32.gmra.mxu2 %vm878_vm3, %v849_v12 }
 0x184   :  { %v406_v11 = vpop.permute.xlu1 %405  ;;  %v318_v28 = vpop.permute.xlu0 %317 }
 0x185   :  { %v753_v57 = vsel %vm739_vm1, %v2413_v56, %v318_v28  ;;  %v797_v40 = vsel %vm739_vm1, %v2408_v54, %v406_v11 }
 0x186   :  { %v818_v58 = vsel %vm804_vm2, %v753_v57, %v574_v62  ;;  %v1194_v62 = vpop.f32.mrf.mxu2  ;;  %v1510_v57 = vld [vmem:[%s3072_s3] sm:$0xff] }
 0x187   :  { %1779 = vmatmul.msk.f32.gmra.mxu0 %vm878_vm3, %v818_v58  ;;  %1533 = vmatpush.msrb.mxu1 %v1510_v57 }
 0x18c   :  { %v382_v18 = vpop.permute.xlu1 %381  ;;  %v662_v48 = vpop.permute.xlu0 %661 }
 0x18d   :  { %v785_v29 = vsel %vm739_vm1, %v2433_v26, %v382_v18  ;;  %v862_v59 = vsel %vm804_vm2, %v797_v40, %v662_v48  ;;  %v640_v26 = vpop.permute.xlu2 %639  ;;  %v2848_v40 = vpop.f32.mrf.mxu3 }
 0x18e   :  { %1823 = vmatmul.msk.f32.gmra.mxu3 %vm878_vm3, %v862_v59  ;;  %v850_v56 = vsel %vm804_vm2, %v785_v29, %v638_v15 }
 0x18f   :  { %1811 = vmatmul.msk.f32.gmra.mxu2 %vm878_vm3, %v850_v56 }
 0x194   :  { %v408_v22 = vpop.permute.xlu1 %407  ;;  %v320_v20 = vpop.permute.xlu0 %319 }
 0x195   :  { %v754_v54 = vsel %vm739_vm1, %v2457_v46, %v320_v20  ;;  %v798_v35 = vsel %vm739_vm1, %v2472_v2, %v408_v22  ;;  %v578_v30 = vpop.permute.xlu2 %577  ;;  %v2852_v29 = vpop.f32.mrf.mxu3 }
 0x196   :  { %v819_v13 = vsel %vm804_vm2, %v754_v54, %v576_v4  ;;  %v2858_v4 = vpop.f32.mrf.mxu0 }
 0x197   :  { %1780 = vmatmul.msk.f32.gmra.mxu0 %vm878_vm3, %v819_v13 }
 0x19c   :  { %v384_v25 = vpop.permute.xlu1 %383  ;;  %v664_v7 = vpop.permute.xlu0 %663 }
 0x19d   :  { %v786_v34 = vsel %vm739_vm1, %v2493_v33, %v384_v25  ;;  %v863_v9 = vsel %vm804_vm2, %v798_v35, %v664_v7  ;;  %v2811_v33 = vpop.f32.mrf.mxu1  ;;  %v412_v36 = vpop.permute.xlu2 %411 }
 0x19e   :  { %1824 = vmatmul.msk.f32.gmra.mxu3 %vm878_vm3, %v863_v9  ;;  %v851_v46 = vsel %vm804_vm2, %v786_v34, %v640_v26  ;;  %v800_v51 = vsel %vm739_vm1, %v2558_v5, %v412_v36  ;;  %v2856_v56 = vpop.f32.mrf.mxu3  ;;  %v2864_v13 = vpop.f32.mrf.mxu0  ;;  %v1192_v9 = vadd.f32 %v2578_v52, %v1191_v17 }
 0x19f   :  { %1812 = vmatmul.msk.f32.gmra.mxu2 %vm878_vm3, %v851_v46 }
 0x1a4   :  { %v410_v21 = vpop.permute.xlu1 %409  ;;  %v322_v61 = vpop.permute.xlu0 %321 }
 0x1a5   :  { %v755_v2 = vsel %vm739_vm1, %v2508_v0, %v322_v61  ;;  %v799_v39 = vsel %vm739_vm1, %v2513_v45, %v410_v21  ;;  %v2819_v0 = vpop.f32.mrf.mxu1  ;;  %v414_v6 = vpop.permute.xlu2 %413  ;;  %v1195_v61 = vadd.f32 %v2578_v52, %v1194_v62 }
 0x1a6   :  { %v820_v38 = vsel %vm804_vm2, %v755_v2, %v578_v30  ;;  %v801_v5 = vsel %vm739_vm1, %v2611_v14, %v414_v6  ;;  %v1197_v14 = vpop.f32.mrf.mxu2  ;;  %v2862_v54 = vpop.f32.mrf.mxu3 }
 0x1a7   :  { %1781 = vmatmul.msk.f32.gmra.mxu0 %vm878_vm3, %v820_v38  ;;  %v2870_v7 = vpop.f32.mrf.mxu0  ;;  %v1317_v38 = vmax.f32 %v1192_v9, 0.0  ;;  %v1198_v36 = vadd.f32 %v2578_v52, %v1197_v14 }
 0x1ac   :  { %v324_v37 = vpop.permute.xlu1 %323  ;;  %v666_v50 = vpop.permute.xlu0 %665 }
 0x1ad   :  { %v864_v10 = vsel %vm804_vm2, %v799_v39, %v666_v50  ;;  %v756_v41 = vsel %vm739_vm1, %v2563_v31, %v324_v37  ;;  %v2829_v27 = vpop.f32.mrf.mxu1  ;;  %v672_v8 = vpop.permute.xlu2 %671  ;;  %v1318_v37 = vmax.f32 %v1195_v61, 0.0 }
 0x1ae   :  { %1825 = vmatmul.msk.f32.gmra.mxu3 %vm878_vm3, %v864_v10  ;;  %v1200_v58 = vpop.f32.mrf.mxu2  ;;  %v2868_v25 = vpop.f32.mrf.mxu3 }
 0x1af   :  { %v1201_v50 = vadd.f32 %v2578_v52, %v1200_v58 }
 0x1b3   :  { %v2877_v21 = vpop.f32.mrf.mxu0 }
 0x1b4   :  { %v668_v23 = vpop.permute.xlu1 %667  ;;  %v580_v43 = vpop.permute.xlu0 %579 }
 0x1b5   :  { %v821_v1 = vsel %vm804_vm2, %v756_v41, %v580_v43  ;;  %v865_v45 = vsel %vm804_vm2, %v800_v51, %v668_v23  ;;  %v2835_v53 = vpop.f32.mrf.mxu1  ;;  %v1419_v51 = vsel %vm1348_vm4, %v1317_v38, 0.0  ;;  %v1319_v41 = vmax.f32 %v1198_v36, 0.0 }
 0x1b6   :  { %1782 = vmatmul.msk.f32.gmra.mxu0 %vm878_vm3, %v821_v1  ;;  %1826 = vmatmul.msk.f32.gmra.mxu3 %vm878_vm3, %v865_v45  ;;  %v1203_v48 = vpop.f32.mrf.mxu2  ;;  %v2875_v30 = vpop.f32.mrf.mxu3 }
 0x1b7   :  { %v1204_v23 = vadd.f32 %v2578_v52, %v1203_v48  ;;  %v1423_v62 = vsel %vm1348_vm4, %v1319_v41, 0.0 }
 0x1bc   :  { %v670_v55 = vpop.permute.xlu0 %669  ;;  %v416_v24 = vpop.permute.xlu1 %415 }
 0x1bd   :  { %v866_v31 = vsel %vm804_vm2, %v801_v5, %v670_v55  ;;  %v802_v63 = vsel %vm739_vm1, %v2642_v44, %v416_v24  ;;  %v2844_v15 = vpop.f32.mrf.mxu1  ;;  %v1421_v5 = vsel %vm1348_vm4, %v1318_v37, 0.0  ;;  %v1320_v55 = vmax.f32 %v1201_v50, 0.0 }
 0x1be   :  { %1827 = vmatmul.msk.f32.gmra.mxu3 %vm878_vm3, %v866_v31  ;;  %v867_v49 = vsel %vm804_vm2, %v802_v63, %v672_v8  ;;  %v1206_v59 = vpop.f32.mrf.mxu2  ;;  %v2886_v45 = vpop.f32.mrf.mxu3  ;;  %v1321_v63 = vmax.f32 %v1204_v23, 0.0 }
 0x1bf   :  { %v1207_v31 = vadd.f32 %v2578_v52, %v1206_v59 }
 0x1c1   :  { %v1322_v14 = vmax.f32 %v1207_v31, 0.0 }
 0x1c3   :  { %v1429_v61 = vsel %vm1348_vm4, %v1322_v14, 0.0  ;;  %v1114_v14 = vadd.f32 %v2578_v52, %v2864_v13 }
 0x1c4   :  { %v418_v12 = vpop.permute.xlu0 %417  ;;  %v674_v28 = vpop.permute.xlu1 %673 }
 0x1c5   :  { %v803_v11 = vsel %vm739_vm1, %v2676_v42, %v418_v12  ;;  %v2850_v18 = vpop.f32.mrf.mxu1  ;;  %v1122_v6 = vpop.f32.mrf.mxu0  ;;  %v1425_v12 = vsel %vm1348_vm4, %v1320_v55, 0.0 }
 0x1c6   :  { %1828 = vmatmul.msk.f32.gmra.mxu3 %vm878_vm3, %v867_v49  ;;  %v868_v44 = vsel %vm804_vm2, %v803_v11, %v674_v28  ;;  %v1209_v20 = vpop.f32.mrf.mxu2  ;;  %v1427_v28 = vsel %vm1348_vm4, %v1321_v63, 0.0 }
 0x1c7   :  { %v1210_v8 = vadd.f32 %v2578_v52, %v1209_v20 }
 0x1cd   :  { %v2854_v42 = vpop.f32.mrf.mxu1 }
 0x1ce   :  { %1829 = vmatmul.msk.f32.gmra.mxu3 %vm878_vm3, %v868_v44  ;;  %v1212_v35 = vpop.f32.mrf.mxu2  ;;  %v1323_v44 = vmax.f32 %v1210_v8, 0.0 }
 0x1cf   :  { %v1213_v58 = vadd.f32 %v2578_v52, %v1212_v35 }
 0x1d0   :  { %v1431_v20 = vsel %vm1348_vm4, %v1323_v44, 0.0  ;;  %v1117_v44 = vadd.f32 %v2578_v52, %v2870_v7 }
 0x1d1   :  { %v2895_v48 = vpop.f32.mrf.mxu3  ;;  %v1324_v38 = vmax.f32 %v1213_v58, 0.0 }
 0x1d3   :  { %v1433_v50 = vsel %vm1348_vm4, %v1324_v38, 0.0 }
 0x1d5   :  { %v2860_v22 = vpop.f32.mrf.mxu1 }
 0x1d6   :  { %v1215_v46 = vpop.f32.mrf.mxu2 }
 0x1d7   :  { %v1216_v36 = vadd.f32 %v2578_v52, %v1215_v46 }
 0x1db   :  { %v1125_v59 = vpop.f32.mrf.mxu0 }
 0x1dd   :  { %v2866_v26 = vpop.f32.mrf.mxu1 }
 0x1de   :  { %v1218_v43 = vpop.f32.mrf.mxu2 }
 0x1e2   :  { %v2902_v35 = vpop.f32.mrf.mxu3 }
 0x1e5   :  { %v2872_v34 = vpop.f32.mrf.mxu1 }
 0x1f1   :  { %v1221_v57 = vpop.f32.mrf.mxu2 }
 0x1f3   :  { %v1128_v41 = vpop.f32.mrf.mxu0 }
 0x1fb   :  { %v1188_v2 = vpop.f32.mrf.mxu1 }
 0x1fc   :  { %v1189_v39 = vadd.f32 %v2578_v52, %v1188_v2 }
 0x1fe   :  { %v1316_v10 = vmax.f32 %v1189_v39, 0.0 }
 0x200   :  { %v1418_v1 = vsel %vm1348_vm4, %v1316_v10, 0.0  ;;  %v1325_v10 = vmax.f32 %v1216_v36, 0.0 }
 0x201   :  { %v1420_v17 = vadd.f32 %v1419_v51, %v1418_v1  ;;  %v1219_v51 = vadd.f32 %v2578_v52, %v1218_v43  ;;  %v1111_v43 = vadd.f32 %v2578_v52, %v2858_v4  ;;  %v1234_v4 = vadd.f32 %v2578_v52, %v2848_v40 }
 0x202   :  { %v1224_v37 = vpop.f32.mrf.mxu2  ;;  %v1435_v1 = vsel %vm1348_vm4, %v1325_v10, 0.0  ;;  %v1237_v10 = vadd.f32 %v2578_v52, %v2852_v29  ;;  %v1129_v29 = vadd.f32 %v2578_v52, %v1128_v41  ;;  %v1246_v41 = vadd.f32 %v2578_v52, %v2868_v25 }
 0x203   :  { %v1422_v24 = vadd.f32 %v1421_v5, %v1420_v17  ;;  %v1326_v17 = vmax.f32 %v1219_v51, 0.0  ;;  %v1222_v5 = vadd.f32 %v2578_v52, %v1221_v57  ;;  %v1225_v63 = vadd.f32 %v2578_v52, %v1224_v37 }
 0x204   :  { %v1131_v8 = vpop.f32.mrf.mxu0  ;;  %v1290_v57 = vmax.f32 %v1111_v43, 0.0  ;;  %v1123_v37 = vadd.f32 %v2578_v52, %v1122_v6  ;;  %v1243_v43 = vadd.f32 %v2578_v52, %v2862_v54 }
 0x205   :  { %v1424_v49 = vadd.f32 %v1423_v62, %v1422_v24  ;;  %v1437_v46 = vsel %vm1348_vm4, %v1326_v17, 0.0  ;;  %v1327_v24 = vmax.f32 %v1222_v5, 0.0  ;;  %v2907_v62 = vpop.f32.mrf.mxu3  ;;  %v1331_v17 = vmax.f32 %v1234_v4, 0.0 }
 0x206   :  { %v1360_v36 = vsel %vm1348_vm4, %v1290_v57, 0.0  ;;  %v1240_v5 = vadd.f32 %v2578_v52, %v2856_v56  ;;  %v1132_v56 = vadd.f32 %v2578_v52, %v1131_v8  ;;  %v1334_v8 = vmax.f32 %v1243_v43, 0.0 }
 0x207   :  { %v1426_v11 = vadd.f32 %v1425_v12, %v1424_v49  ;;  %v1361_v6 = vadd.f32 %v1360_v36, %v2745_v16  ;;  %v1258_v43 = vadd.f32 %v2578_v52, %v2902_v35  ;;  %v1150_v35 = vadd.f32 %v2578_v52, %v2783_v32 }
 0x208   :  { %v1297_v25 = vmax.f32 %v1132_v56, 0.0 }
 0x209   :  { %v1428_v9 = vadd.f32 %v1427_v28, %v1426_v11  ;;  %v1439_v11 = vsel %vm1348_vm4, %v1327_v24, 0.0  ;;  %v1328_v28 = vmax.f32 %v1225_v63, 0.0  ;;  %v1332_v63 = vmax.f32 %v1237_v10, 0.0 }
 0x20a   :  { %v1335_v10 = vmax.f32 %v1246_v41, 0.0 }
 0x20b   :  { %v1430_v2 = vadd.f32 %v1429_v61, %v1428_v9  ;;  %v1291_v61 = vmax.f32 %v1114_v14, 0.0  ;;  %v1449_v4 = vsel %vm1348_vm4, %v1332_v63, 0.0 }
 0x20d   :  { %v1432_v39 = vadd.f32 %v1431_v20, %v1430_v2  ;;  %v1120_v2 = vadd.f32 %v2578_v52, %v2877_v21  ;;  %v1441_v20 = vsel %vm1348_vm4, %v1328_v28, 0.0  ;;  %v1362_v40 = vsel %vm1348_vm4, %v1291_v61, 0.0 }
 0x20e   :  { %v1333_v28 = vmax.f32 %v1240_v5, 0.0 }
 0x20f   :  { %v1434_v23 = vadd.f32 %v1433_v50, %v1432_v39  ;;  %v1292_v39 = vmax.f32 %v1117_v44, 0.0 }
 0x211   :  { %v1436_v55 = vadd.f32 %v1435_v1, %v1434_v23  ;;  %v2923_v38 = vpop.f32.mrf.mxu3  ;;  %v1293_v23 = vmax.f32 %v1120_v2, 0.0  ;;  %v1126_v1 = vadd.f32 %v2578_v52, %v1125_v59 }
 0x212   :  { %v1227_v31 = vpop.f32.mrf.mxu2 }
 0x213   :  { %v1438_v49 = vadd.f32 %v1437_v46, %v1436_v55  ;;  %v1228_v12 = vadd.f32 %v2578_v52, %v1227_v31  ;;  %v1364_v31 = vsel %vm1348_vm4, %v1292_v39, 0.0  ;;  %v1294_v46 = vmax.f32 %v1123_v37, 0.0 }
 0x214   :  { %v1134_v13 = vpop.f32.mrf.mxu0  ;;  %v1295_v14 = vmax.f32 %v1126_v1, 0.0 }
 0x215   :  { %v1440_v58 = vadd.f32 %v1439_v11, %v1438_v49  ;;  %v1329_v9 = vmax.f32 %v1228_v12, 0.0  ;;  %v1363_v49 = vadd.f32 %v1362_v40, %v1361_v6  ;;  %v1366_v12 = vsel %vm1348_vm4, %v1293_v23, 0.0 }
 0x216   :  { %v1447_v11 = vsel %vm1348_vm4, %v1331_v17, 0.0  ;;  %v1368_v54 = vsel %vm1348_vm4, %v1294_v46, 0.0  ;;  %v1135_v61 = vadd.f32 %v2578_v52, %v1134_v13  ;;  %v1370_v39 = vsel %vm1348_vm4, %v1295_v14, 0.0 }
 0x217   :  { %v1442_v7 = vadd.f32 %v1441_v20, %v1440_v58  ;;  %v1443_v21 = vsel %vm1348_vm4, %v1329_v9, 0.0  ;;  %v1365_v57 = vadd.f32 %v1364_v31, %v1363_v49  ;;  %v1296_v9 = vmax.f32 %v1129_v29, 0.0 }
 0x218   :  { %v1249_v20 = vadd.f32 %v2578_v52, %v2875_v30  ;;  %v1252_v13 = vadd.f32 %v2578_v52, %v2886_v45  ;;  %v1298_v40 = vmax.f32 %v1135_v61, 0.0  ;;  %v1453_v30 = vsel %vm1348_vm4, %v1334_v8, 0.0 }
 0x219   :  { %v1444_v24 = vadd.f32 %v1443_v21, %v1442_v7  ;;  %v1367_v36 = vadd.f32 %v1366_v12, %v1365_v57  ;;  %v1255_v17 = vadd.f32 %v2578_v52, %v2895_v48  ;;  %v1374_v6 = vsel %vm1348_vm4, %v1297_v25, 0.0 }
 0x21a   :  { %v1336_v1 = vmax.f32 %v1249_v20, 0.0  ;;  %v1144_v46 = vadd.f32 %v2578_v52, %v2766_v19  ;;  %v1455_v45 = vsel %vm1348_vm4, %v1335_v10, 0.0  ;;  %v1337_v29 = vmax.f32 %v1252_v13, 0.0 }
 0x21b   :  { %v1369_v21 = vadd.f32 %v1368_v54, %v1367_v36  ;;  %v1376_v49 = vsel %vm1348_vm4, %v1298_v40, 0.0  ;;  %v1338_v12 = vmax.f32 %v1255_v17, 0.0  ;;  %v1339_v54 = vmax.f32 %v1258_v43, 0.0 }
 0x21c   :  { %v1457_v48 = vsel %vm1348_vm4, %v1336_v1, 0.0  ;;  %v1301_v41 = vmax.f32 %v1144_v46, 0.0  ;;  %v1459_v57 = vsel %vm1348_vm4, %v1337_v29, 0.0  ;;  %v1153_v20 = vadd.f32 %v2578_v52, %v2794_v3 }
 0x21d   :  { %v1371_v5 = vadd.f32 %v1370_v39, %v1369_v21  ;;  %v1303_v25 = vmax.f32 %v1150_v35, 0.0  ;;  %v1264_v13 = vadd.f32 %v2578_v52, %v2923_v38  ;;  %v1162_v1 = vadd.f32 %v2578_v52, %v2819_v0 }
 0x21e   :  { %v1382_v32 = vsel %vm1348_vm4, %v1301_v41, 0.0  ;;  %v1304_v40 = vmax.f32 %v1153_v20, 0.0  ;;  %v1168_v0 = vadd.f32 %v2578_v52, %v2835_v53 }
 0x21f   :  { %v1307_v29 = vmax.f32 %v1162_v1, 0.0 }
 0x220   :  { %v1388_v46 = vsel %vm1348_vm4, %v1304_v40, 0.0  ;;  %v1309_v53 = vmax.f32 %v1168_v0, 0.0 }
 0x221   :  { %v2946_v44 = vpop.f32.mrf.mxu3 }
 0x222   :  { %v1230_v50 = vpop.f32.mrf.mxu2  ;;  %v1267_v38 = vadd.f32 %v2578_v52, %v2946_v44 }
 0x223   :  { %v1231_v51 = vadd.f32 %v2578_v52, %v1230_v50  ;;  %v1451_v50 = vsel %vm1348_vm4, %v1333_v28, 0.0 }
 0x224   :  { %v1137_v58 = vpop.f32.mrf.mxu0 }
 0x225   :  { %v1330_v55 = vmax.f32 %v1231_v51, 0.0  ;;  %v1138_v7 = vadd.f32 %v2578_v52, %v1137_v58  ;;  %v1372_v51 = vsel %vm1348_vm4, %v1296_v9, 0.0  ;;  %v1261_v9 = vadd.f32 %v2578_v52, %v2907_v62 }
 0x226   :  { %v1156_v62 = vadd.f32 %v2578_v52, %v2805_v60 }
 0x227   :  { %v1445_v59 = vsel %vm1348_vm4, %v1330_v55, 0.0  ;;  %v1299_v31 = vmax.f32 %v1138_v7, 0.0  ;;  %v1340_v10 = vmax.f32 %v1261_v9, 0.0 }
 0x228   :  { %v1446_v16 = vadd.f32 %v1445_v59, %v1444_v24  ;;  %v1373_v24 = vadd.f32 %v1372_v51, %v1371_v5  ;;  %v1305_v17 = vmax.f32 %v1156_v62, 0.0  ;;  %v1183_v62 = vadd.f32 %v2578_v52, %v2866_v26 }
 0x229   :  { %v1465_v5 = vsel %vm1348_vm4, %v1340_v10, 0.0 }
 0x22a   :  { %v1448_v2 = vadd.f32 %v1447_v11, %v1446_v16  ;;  %v1375_v14 = vadd.f32 %v1374_v6, %v1373_v24  ;;  %v1147_v16 = vadd.f32 %v2578_v52, %v2775_v47  ;;  %v1378_v11 = vsel %vm1348_vm4, %v1299_v31, 0.0 }
 0x22b   :  { %v1461_v47 = vsel %vm1348_vm4, %v1338_v12, 0.0  ;;  %v1341_v6 = vmax.f32 %v1264_v13, 0.0 }
 0x22c   :  { %v1450_v37 = vadd.f32 %v1449_v4, %v1448_v2  ;;  %v1377_v58 = vadd.f32 %v1376_v49, %v1375_v14  ;;  %v1302_v8 = vmax.f32 %v1147_v16, 0.0  ;;  %v1390_v49 = vsel %vm1348_vm4, %v1305_v17, 0.0  ;;  %v1590_v17 = vld [vmem:[%s3076_s7 + $0x18] sm:$0xff] }
 0x22d   :  { %1611 = vmatpush.msrb.mxu2 %v1590_v17  ;;  %v1587_v17 = vld [vmem:[%s3076_s7] sm:$0xff] }
 0x22e   :  { %v1452_v23 = vadd.f32 %v1451_v50, %v1450_v37  ;;  %v1379_v4 = vadd.f32 %v1378_v11, %v1377_v58  ;;  %v1463_v50 = vsel %vm1348_vm4, %v1339_v54, 0.0  ;;  %v1384_v3 = vsel %vm1348_vm4, %v1302_v8, 0.0 }
 0x22f   :  { %v1174_v11 = vadd.f32 %v2578_v52, %v2850_v18  ;;  %v1180_v18 = vadd.f32 %v2578_v52, %v2860_v22  ;;  %v1892_v8 = vmov 256.0  }
 0x230   :  { %v1454_v55 = vadd.f32 %v1453_v30, %v1452_v23  ;;  %v1159_v23 = vadd.f32 %v2578_v52, %v2811_v33  ;;  %v1386_v30 = vsel %vm1348_vm4, %v1303_v25, 0.0  ;;  %v1165_v33 = vadd.f32 %v2578_v52, %v2829_v27 }
 0x231   :  { %v1269_v63 = vpop.f32.mrf.mxu3  ;;  %v1171_v27 = vadd.f32 %v2578_v52, %v2844_v15  ;;  %v1177_v15 = vadd.f32 %v2578_v52, %v2854_v42  ;;  %1857 = vrcp.f32 %v1892_v8  ;;  %v1311_v20 = vmax.f32 %v1174_v11, 0.0 }
 0x232   :  { %v1456_v59 = vadd.f32 %v1455_v45, %v1454_v55  ;;  %v1306_v45 = vmax.f32 %v1159_v23, 0.0  ;;  %v1270_v44 = vadd.f32 %v2578_v52, %v1269_v63  ;;  %v1308_v16 = vmax.f32 %v1165_v33, 0.0 }
 0x233   :  { %v1140_v56 = vpop.f32.mrf.mxu0  ;;  %v1310_v9 = vmax.f32 %v1171_v27, 0.0  ;;  %v1313_v22 = vmax.f32 %v1180_v18, 0.0  ;;  %v1402_v13 = vsel %vm1348_vm4, %v1311_v20, 0.0  ;;  %v1853_v20 = vld [vmem:[%s3073_s4] ss:$0 sm:$0xff] }
 0x234   :  { %v1458_v19 = vadd.f32 %v1457_v48, %v1456_v59  ;;  %v1141_v28 = vadd.f32 %v2578_v52, %v1140_v56  ;;  %v1467_v59 = vsel %vm1348_vm4, %v1341_v6, 0.0  ;;  %v1342_v48 = vmax.f32 %v1267_v38, 0.0 }
 0x235   :  { %v1392_v56 = vsel %vm1348_vm4, %v1306_v45, 0.0  ;;  %v1343_v35 = vmax.f32 %v1270_v44, 0.0  ;;  %v1396_v54 = vsel %vm1348_vm4, %v1308_v16, 0.0  ;;  %v1400_v42 = vsel %vm1348_vm4, %v1310_v9, 0.0 }
 0x236   :  { %v1460_v61 = vadd.f32 %v1459_v57, %v1458_v19  ;;  %v1300_v2 = vmax.f32 %v1141_v28, 0.0  ;;  %v1394_v19 = vsel %vm1348_vm4, %v1307_v29, 0.0  ;;  %v1469_v41 = vsel %vm1348_vm4, %v1342_v48, 0.0 }
 0x237   :  { %v1858_v23 = vpop.eup %1857 }
 0x238   :  { %v1462_v36 = vadd.f32 %v1461_v47, %v1460_v61  ;;  %v1380_v39 = vsel %vm1348_vm4, %v1300_v2, 0.0  ;;  %v1398_v2 = vsel %vm1348_vm4, %v1309_v53, 0.0  ;;  %v1488_v45 = vmul.f32 256.0, %v1858_v23 }
 0x239   :  { %v1381_v37 = vadd.f32 %v1380_v39, %v1379_v4  ;;  %v1272_v7 = vpop.f32.mrf.mxu3  ;;  %vm1492_vm5 = vweird.f32 %v1858_v23 }
 0x23a   :  { %v1464_v21 = vadd.f32 %v1463_v50, %v1462_v36  ;;  %v1273_v63 = vadd.f32 %v2578_v52, %v1272_v7  ;;  %v1471_v36 = vsel %vm1348_vm4, %v1343_v35, 0.0  ;;  %v1312_v7 = vmax.f32 %v1177_v15, 0.0 }
 0x23b   :  { %v1383_v51 = vadd.f32 %v1382_v32, %v1381_v37  ;;  %v1489_v44 = vsub.f32 1.0, %v1488_v45 }
 0x23c   :  { %v1466_v55 = vadd.f32 %v1465_v5, %v1464_v21  ;;  %v1344_v39 = vmax.f32 %v1273_v63, 0.0  ;;  %v1863_v21 = vld [vmem:[%s3071_s2] ss:$0 sm:$0xff]  ;;  %v1589_v5 = vld [vmem:[%s3076_s7 + $0x10] sm:$0xff] }
 0x23d   :  { %v1385_v60 = vadd.f32 %v1384_v3, %v1383_v51  ;;  %v1186_v51 = vadd.f32 %v1863_v21, %v2872_v34  ;;  %v1406_v34 = vsel %vm1348_vm4, %v1313_v22, 0.0  ;;  %1612 = vmatpush.msrb.mxu2 %v1589_v5  ;;  %v1490_v27 = vmul.f32 %v1858_v23, %v1489_v44 }
 0x23e   :  { %v1468_v12 = vadd.f32 %v1467_v59, %v1466_v55  ;;  %v1473_v3 = vsel %vm1348_vm4, %v1344_v39, 0.0 }
 0x23f   :  { %v1387_v31 = vadd.f32 %v1386_v30, %v1385_v60  ;;  %v1404_v60 = vsel %vm1348_vm4, %v1312_v7, 0.0  ;;  %v1315_v55 = vmax.f32 %v1186_v51, 0.0 }
 0x240   :  { %v1470_v57 = vadd.f32 %v1469_v41, %v1468_v12  ;;  %v1491_v41 = vadd.f32 %v1858_v23, %v1490_v27 }
 0x241   :  { %v1389_v24 = vadd.f32 %v1388_v46, %v1387_v31  ;;  %v1275_v43 = vpop.f32.mrf.mxu3  ;;  %v1410_v59 = vsel %vm1348_vm4, %v1315_v55, 0.0 }
 0x242   :  { %v1276_v61 = vadd.f32 %v2578_v52, %v1275_v43  ;;  %v1472_v25 = vadd.f32 %v1471_v36, %v1470_v57 }
 0x243   :  { %v1391_v14 = vadd.f32 %v1390_v49, %v1389_v24 }
 0x244   :  { %v1345_v50 = vmax.f32 %v1276_v61, 0.0  ;;  %v1474_v1 = vadd.f32 %v1473_v3, %v1472_v25 }
 0x245   :  { %v1393_v28 = vadd.f32 %v1392_v56, %v1391_v14 }
 0x246   :  { %v1475_v26 = vsel %vm1348_vm4, %v1345_v50, 0.0 }
 0x247   :  { %v1395_v58 = vadd.f32 %v1394_v19, %v1393_v28  ;;  %v1476_v33 = vadd.f32 %v1475_v26, %v1474_v1  ;;  %v1588_v26 = vld [vmem:[%s3076_s7 + $0x8] sm:$0xff] }
 0x248   :  { %1613 = vmatpush.msrb.mxu2 %v1588_v26 }
 0x249   :  { %v1397_v47 = vadd.f32 %v1396_v54, %v1395_v58  ;;  %v1278_v4 = vpop.f32.mrf.mxu3  ;;  %v1493_v54 = vsel %vm1492_vm5, %v1858_v23, %v1491_v41 }
 0x24a   :  { %v1279_v32 = vadd.f32 %v2578_v52, %v1278_v4  ;;  %v1314_v52 = vmax.f32 %v1183_v62, 0.0  ;;  %v1893_v4 = vmov 2.0   ;;  %1614 = vmatpush.msrb.mxu2 %v1587_v17 }
 0x24b   :  { %v1399_v37 = vadd.f32 %v1398_v2, %v1397_v47  ;;  %1859 = vrcp.f32 %v1893_v4 }
 0x24c   :  { %v1346_v40 = vmax.f32 %v1279_v32, 0.0  ;;  %v1408_v0 = vsel %vm1348_vm4, %v1314_v52, 0.0 }
 0x24d   :  { %v1401_v10 = vadd.f32 %v1400_v42, %v1399_v37 }
 0x24e   :  { %v1477_v31 = vsel %vm1348_vm4, %v1346_v40, 0.0 }
 0x24f   :  { %v1403_v30 = vadd.f32 %v1402_v13, %v1401_v10  ;;  %v1478_v43 = vadd.f32 %v1477_v31, %v1476_v33 }
 0x251   :  { %v1281_v6 = vpop.f32.mrf.mxu3  ;;  %v1405_v38 = vadd.f32 %v1404_v60, %v1403_v30  ;;  %v1860_v8 = vpop.eup %1859 }
 0x252   :  { %v1282_v46 = vadd.f32 %v1863_v21, %v1281_v6  ;;  %v1547_v36 = vmul.f32 2.0, %v1860_v8  ;;  %vm1551_vm9 = vweird.f32 %v1860_v8 }
 0x253   :  { %v1407_v29 = vadd.f32 %v1406_v34, %v1405_v38 }
 0x254   :  { %v1347_v24 = vmax.f32 %v1282_v46, 0.0  ;;  %v1548_v25 = vsub.f32 1.0, %v1547_v36 }
 0x255   :  { %v1409_v49 = vadd.f32 %v1408_v0, %v1407_v29 }
 0x256   :  { %v1479_v48 = vsel %vm1348_vm4, %v1347_v24, 0.0  ;;  %v1549_v7 = vmul.f32 %v1860_v8, %v1548_v25  ;;  %v1854_v24 = vld [vmem:[%s3074_s5] ss:$0 sm:$0xff]  ;;  %s1628_s5 = sshll.u32 %s3078_s9, 4  ;;  %s1629_s5 = int_to_ptr.hbm [resolvable:$true] %s1628_s5 }
 0x257   :  { %v1411_v12 = vadd.f32 %v1410_v59, %v1409_v49  ;;  %v1480_v14 = vadd.f32 %v1479_v48, %v1478_v43  ;;  %v1855_v59 = vld [vmem:[%s3075_s6] ss:$0 sm:$0xff] }
 0x258   :  { %v1550_v22 = vadd.f32 %v1860_v8, %v1549_v7 }
 0x259   :  { %v1412_v56 = vrot.slane %v1411_v12, 4  ;;  %v1481_v16 = vrot.slane %v1480_v14, 4 }
 0x25a   :  { %v1552_v21 = vsel %vm1551_vm9, %v1860_v8, %v1550_v22 }
 0x25b   :  { %v1413_v19 = vadd.f32 %v1412_v56, %v1411_v12  ;;  %v1482_v53 = vadd.f32 %v1481_v16, %v1480_v14  ;;  %v1856_v14 = vld [vmem:[%s3077_s8] ss:$0 sm:$0xff] }
 0x25d   :  { %v1414_v11 = vrot.slane %v1413_v19, 2  ;;  %v1483_v28 = vrot.slane %v1482_v53, 2 }
 0x25f   :  { %v1415_v35 = vadd.f32 %v1414_v11, %v1413_v19  ;;  %v1484_v63 = vadd.f32 %v1483_v28, %v1482_v53 }
 0x261   :  { %v1416_v57 = vrot.slane %v1415_v35, 1  ;;  %v1485_v58 = vrot.slane %v1484_v63, 1 }
 0x263   :  { %v1417_v9 = vadd.f32 %v1416_v57, %v1415_v35  ;;  %v1486_v15 = vadd.f32 %v1485_v58, %v1484_v63 }
 0x265   :  { %v1494_v61 = vmul.f32 %v1493_v54, %v1417_v9  ;;  %v1495_v2 = vmul.f32 %v1493_v54, %v1486_v15 }
 0x267   :  { %v1500_v18 = vsel %vm1499_vm6, %v1495_v2, %v1494_v61 }
 0x268   :  { %1504 = vst.msk [vmem:[#allocation2] sm:$0x3] %vm1503_vm7, %v1500_v18 }
 0x26f   :  { %v1509_v47 = vld [vmem:[#allocation2] sm:$0x3] }
 0x270   :  { %1830 = vmatmul.msk.f32.vlgmr.msrb.gmra.mxu1 %vm1348_vm4, %v1509_v47 }
 0x2ed   :  { %v1535_v39 = vpop.f32.mrf.mxu1 }
 0x2ee   :  { %v1536_v32 = vadd.f32 %v1853_v20, %v1535_v39 }
 0x2f0   :  { %v1539_v37 = vsel %vm1538_vm8, %v1536_v32, 0.0 }
 0x2f1   :  { %v1540_v42 = vrot.slane %v1539_v37, 4 }
 0x2f3   :  { %v1541_v62 = vadd.f32 %v1540_v42, %v1539_v37 }
 0x2f5   :  { %v1542_v50 = vrot.slane %v1541_v62, 2 }
 0x2f7   :  { %v1543_v10 = vadd.f32 %v1542_v50, %v1541_v62 }
 0x2f9   :  { %v1544_v13 = vrot.slane %v1543_v10, 1 }
 0x2fb   :  { %v1545_v51 = vadd.f32 %v1544_v13, %v1543_v10 }
 0x2fd   :  { %v1553_v3 = vmul.f32 %v1552_v21, %v1545_v51 }
 0x2ff   :  { %v1554_v40 = vsub.f32 %v1536_v32, %v1553_v3 }
 0x301   :  { %v1555_v23 = vmul.f32 %v1554_v40, %v1554_v40 }
 0x303   :  { %v1556_v30 = vsel %vm1538_vm8, %v1555_v23, 0.0 }
 0x304   :  { %v1557_v1 = vrot.slane %v1556_v30, 4 }
 0x306   :  { %v1558_v60 = vadd.f32 %v1557_v1, %v1556_v30 }
 0x308   :  { %v1559_v52 = vrot.slane %v1558_v60, 2 }
 0x30a   :  { %v1560_v5 = vadd.f32 %v1559_v52, %v1558_v60 }
 0x30c   :  { %v1561_v34 = vrot.slane %v1560_v5, 1 }
 0x30e   :  { %v1562_v6 = vadd.f32 %v1561_v34, %v1560_v5 }
 0x310   :  { %v1563_v38 = vmul.f32 %v1562_v6, %v1552_v21 }
 0x312   :  { %v1564_v55 = vadd.f32 1e-05, %v1563_v38 }
 0x314   :  { %1861 = vrsqrt.f32 %v1564_v55  ;;  %vm1571_vm11 = vweird.f32 %v1564_v55 }
 0x31a   :  { %v1862_v31 = vpop.eup %1861 }
 0x31b   :  { %v1566_v46 = vmul.f32 %v1862_v31, %v1564_v55  ;;  %vm1572_vm10 = vweird.f32 %v1862_v31 }
 0x31c   :  { %vm1573_vm12 = vmor %vm1571_vm11, %vm1572_vm10 }
 0x31d   :  { %v1567_v45 = vmul.f32 %v1862_v31, %v1566_v46 }
 0x31f   :  { %v1568_v33 = vmul.f32 0.5, %v1567_v45 }
 0x321   :  { %v1569_v29 = vsub.f32 1.5, %v1568_v33 }
 0x323   :  { %v1570_v0 = vmul.f32 %v1862_v31, %v1569_v29 }
 0x325   :  { %v1574_v43 = vsel %vm1573_vm12, %v1862_v31, %v1570_v0 }
 0x326   :  { %v1575_v49 = vmul.f32 %v1574_v43, %v1554_v40 }
 0x328   :  { %v1580_v48 = vmul.f32 %v1854_v24, %v1575_v49 }
 0x32a   :  { %v1585_v44 = vadd.f32 %v1855_v59, %v1580_v48 }
 0x32c   :  { %v1586_v12 = vmax.f32 %v1585_v44, 0.0 }
 0x32e   :  { %1831 = vmatmul.msk.f32.vlgmr.msrb.gmra.mxu2 %vm1595_vm13, %v1586_v12 }
 0x3b1   :  { %v1616_v56 = vpop.f32.mrf.mxu2 }
 0x3b2   :  { %v1617_v16 = vadd.f32 %v1856_v14, %v1616_v56 }
 0x3b4   :  { %1620 = vst.msk [vmem:[#allocation3] sm:$0x3] %vm1619_vm14, %v1617_v16 }
 0x3b5   :  { %1631 = dma.vmem_to_hbm [thread:$0]  %s1627_s29, 32, %s1629_s5, [#allocation4]  }
 0x3b6   :  { %1888 = dma.done.wait [#allocation4], 32  }
 0x3b7   :  { %1889 = vsyncadd [#allocation4], 4294967264 }
 0x3b8   :  { %1636 = vsyncpa [#allocation4], 1 }

</bundles_post_ra>
